<compile_context>
chip_gen: v6e
topology: v6e:2x2x1
jax: 0.10.0
libtpu: 0.0.40
codegen_flags: <defaults>
</compile_context>

<pallas_src>
import functools
import numpy as np
import jax
import jax.numpy as jnp
from jax.experimental import pallas as pl
from jax.experimental.pallas import tpu as pltpu

EPS = 1e-5
LANE = 128
VMEM_LIMIT_BYTES = 48 * 1024 * 1024   # under v7x's 64 MiB physical, ample for v5e/v6e


def _round_up(x, m):
    return (x + m - 1) // m * m


def _compiler_params():
    return pltpu.CompilerParams(
        dimension_semantics=("parallel",),
        vmem_limit_bytes=VMEM_LIMIT_BYTES)


# ----------------------------- Pallas kernels ------------------------------ #

def _store_moments(mom_ref, y_f32):
    # mom_ref block is (1, 8, C): row 0 = per-channel sum, row 1 = sum of squares,
    # rows 2..7 are zero filler so the block keeps an (8, 128)-aligned shape.
    ssum = jnp.sum(y_f32, axis=0, keepdims=True)
    ssq = jnp.sum(y_f32 * y_f32, axis=0, keepdims=True)
    zero = jnp.zeros_like(ssum)
    mom_ref[0] = jnp.concatenate([ssum, ssq] + [zero] * 6, axis=0)


def matmul_moments_kernel(p_ref, w_ref, y_ref, mom_ref):
    # conv (as im2col matmul) for one row tile + per-tile BN moments.
    y = jnp.dot(p_ref[...], w_ref[...], preferred_element_type=jnp.float32)
    y_ref[...] = y
    _store_moments(mom_ref, y)


def dual_matmul_moments_kernel(p2_ref, w2_ref, pd_ref, wd_ref,
                               y2_ref, yd_ref, mom2_ref, momd_ref):
    # conv2 and the 1x1 downsample conv share the same row tiling.
    y2 = jnp.dot(p2_ref[...], w2_ref[...], preferred_element_type=jnp.float32)
    yd = jnp.dot(pd_ref[...], wd_ref[...], preferred_element_type=jnp.float32)
    y2_ref[...] = y2
    yd_ref[...] = yd
    _store_moments(mom2_ref, y2)
    _store_moments(momd_ref, yd)


def scale_bias_relu_kernel(y_ref, s_ref, b_ref, o_ref):
    # BN finalize (scale/bias folded from batch stats + gamma/beta) + ReLU.
    o = jnp.maximum(y_ref[...] * s_ref[...] + b_ref[...], 0.0)
    o_ref[...] = o.astype(o_ref.dtype)


def residual_scale_bias_relu_kernel(y2_ref, yd_ref, s2_ref, sd_ref, b_ref, o_ref):
    # bn2(y2) + bn_d(yd) + ReLU, with both BNs folded into scale/bias.
    o = jnp.maximum(y2_ref[...] * s2_ref[...] + yd_ref[...] * sd_ref[...] + b_ref[...],
                    0.0)
    o_ref[...] = o.astype(o_ref.dtype)


# ------------------------- pallas_call wrappers ----------------------------- #

def _matmul_moments(p, w, tile):
    rows_p, k = p.shape
    cp = w.shape[1]
    nt = rows_p // tile
    flops = 2 * rows_p * k * cp
    bytes_acc = (p.size + w.size) * 2 + rows_p * cp * 4 + nt * 8 * cp * 4
    return pl.pallas_call(
        matmul_moments_kernel,
        out_shape=(jax.ShapeDtypeStruct((rows_p, cp), jnp.float32),
                   jax.ShapeDtypeStruct((nt, 8, cp), jnp.float32)),
        grid=(nt,),
        in_specs=[pl.BlockSpec((tile, k), lambda i: (i, 0)),
                  pl.BlockSpec((k, cp), lambda i: (0, 0))],
        out_specs=(pl.BlockSpec((tile, cp), lambda i: (i, 0)),
                   pl.BlockSpec((1, 8, cp), lambda i: (i, 0, 0))),
        compiler_params=_compiler_params(),
        cost_estimate=pl.CostEstimate(flops=flops, transcendentals=0,
                                      bytes_accessed=bytes_acc),
    )(p, w)


def _dual_matmul_moments(p2, w2, pd, wd, tile):
    rows_p, k2 = p2.shape
    kd = pd.shape[1]
    cp = w2.shape[1]
    nt = rows_p // tile
    flops = 2 * rows_p * (k2 + kd) * cp
    bytes_acc = ((p2.size + w2.size + pd.size + wd.size) * 2
                 + 2 * rows_p * cp * 4 + 2 * nt * 8 * cp * 4)
    return pl.pallas_call(
        dual_matmul_moments_kernel,
        out_shape=(jax.ShapeDtypeStruct((rows_p, cp), jnp.float32),
                   jax.ShapeDtypeStruct((rows_p, cp), jnp.float32),
                   jax.ShapeDtypeStruct((nt, 8, cp), jnp.float32),
                   jax.ShapeDtypeStruct((nt, 8, cp), jnp.float32)),
        grid=(nt,),
        in_specs=[pl.BlockSpec((tile, k2), lambda i: (i, 0)),
                  pl.BlockSpec((k2, cp), lambda i: (0, 0)),
                  pl.BlockSpec((tile, kd), lambda i: (i, 0)),
                  pl.BlockSpec((kd, cp), lambda i: (0, 0))],
        out_specs=(pl.BlockSpec((tile, cp), lambda i: (i, 0)),
                   pl.BlockSpec((tile, cp), lambda i: (i, 0)),
                   pl.BlockSpec((1, 8, cp), lambda i: (i, 0, 0)),
                   pl.BlockSpec((1, 8, cp), lambda i: (i, 0, 0))),
        compiler_params=_compiler_params(),
        cost_estimate=pl.CostEstimate(flops=flops, transcendentals=0,
                                      bytes_accessed=bytes_acc),
    )(p2, w2, pd, wd)


def _scale_bias_relu(y, scale, bias, tile):
    rows_p, cp = y.shape
    nt = rows_p // tile
    return pl.pallas_call(
        scale_bias_relu_kernel,
        out_shape=jax.ShapeDtypeStruct((rows_p, cp), jnp.bfloat16),
        grid=(nt,),
        in_specs=[pl.BlockSpec((tile, cp), lambda i: (i, 0)),
                  pl.BlockSpec((1, cp), lambda i: (0, 0)),
                  pl.BlockSpec((1, cp), lambda i: (0, 0))],
        out_specs=pl.BlockSpec((tile, cp), lambda i: (i, 0)),
        compiler_params=_compiler_params(),
        cost_estimate=pl.CostEstimate(flops=2 * rows_p * cp, transcendentals=0,
                                      bytes_accessed=rows_p * cp * 6 + 2 * cp * 4),
    )(y, scale, bias)


def _residual_finalize(y2, yd, s2, sd, bias, tile):
    rows_p, cp = y2.shape
    nt = rows_p // tile
    return pl.pallas_call(
        residual_scale_bias_relu_kernel,
        out_shape=jax.ShapeDtypeStruct((rows_p, cp), jnp.float32),
        grid=(nt,),
        in_specs=[pl.BlockSpec((tile, cp), lambda i: (i, 0)),
                  pl.BlockSpec((tile, cp), lambda i: (i, 0)),
                  pl.BlockSpec((1, cp), lambda i: (0, 0)),
                  pl.BlockSpec((1, cp), lambda i: (0, 0)),
                  pl.BlockSpec((1, cp), lambda i: (0, 0))],
        out_specs=pl.BlockSpec((tile, cp), lambda i: (i, 0)),
        compiler_params=_compiler_params(),
        cost_estimate=pl.CostEstimate(flops=4 * rows_p * cp, transcendentals=0,
                                      bytes_accessed=3 * rows_p * cp * 4 + 3 * cp * 4),
    )(y2, yd, s2, sd, bias)


# ------------------------------- JAX glue ---------------------------------- #

def im2col_3x3(x_nhwc, stride):
    """3x3, padding=1 patch extraction -> (N*Ho*Wo, 9*C)."""
    N, H, W, C = x_nhwc.shape
    Ho = (H + 2 - 3) // stride + 1
    Wo = (W + 2 - 3) // stride + 1
    xp = jnp.pad(x_nhwc, ((0, 0), (1, 1), (1, 1), (0, 0)))
    cols = []
    for ky in range(3):
        for kx in range(3):
            sl = xp[:, ky:ky + (Ho - 1) * stride + 1:stride,
                       kx:kx + (Wo - 1) * stride + 1:stride, :]
            cols.append(sl.reshape(N * Ho * Wo, C))
    return jnp.concatenate(cols, axis=1), (Ho, Wo)


def _pad2(a, rows, cols):
    return jnp.pad(a, ((0, rows - a.shape[0]), (0, cols - a.shape[1])))


def _bn_scale_bias(mom, n_rows, gamma, beta, cp):
    """Fold batch statistics + gamma/beta into per-channel scale/bias (f32)."""
    tot = jnp.sum(mom, axis=0)                       # (8, cp); rows 0/1 used
    mean = tot[0] / n_rows
    var = jnp.maximum(tot[1] / n_rows - mean * mean, 0.0)
    inv = jax.lax.rsqrt(var + EPS)
    g = jnp.pad(gamma, (0, cp - gamma.shape[0]))
    b = jnp.pad(beta, (0, cp - beta.shape[0]))
    scale = g * inv
    bias = b - mean * scale
    return (scale.reshape(1, cp).astype(jnp.float32),
            bias.reshape(1, cp).astype(jnp.float32))


@functools.partial(jax.jit, static_argnames=("stride",))
def basic_block_forward(x_nchw, params, stride):
    # mask multiply (masks are ones, as in the PyTorch module after add_mask()).
    w1 = params["w1"] * params["mask1"]
    w2 = params["w2"] * params["mask2"]
    wd = params["wd"] * params["maskd"]

    x = jnp.transpose(x_nchw, (0, 2, 3, 1))                  # NCHW -> NHWC
    N, H, W, Cin = x.shape
    planes = w1.shape[0]
    cp = _round_up(planes, LANE)                             # lane-dense channels

    # ---------- conv1 (3x3, stride, pad=1) + bn1 + relu ----------
    p1, (Ho, Wo) = im2col_3x3(x, stride)
    rows = N * Ho * Wo
    tile = min(512, _round_up(rows, 16))                     # bf16 sublane multiple
    rows_p = _round_up(rows, tile)

    k1 = _round_up(9 * Cin, LANE)
    p1 = _pad2(p1, rows_p, k1).astype(jnp.bfloat16)          # zero rows/cols -> exact
    w1_mat = _pad2(jnp.transpose(w1, (2, 3, 1, 0)).reshape(9 * Cin, planes),
                   k1, cp).astype(jnp.bfloat16)

    y1, mom1 = _matmul_moments(p1, w1_mat, tile)             # Pallas pass 1
    s1, c1 = _bn_scale_bias(mom1, rows, params["g1"], params["b1"], cp)
    out1 = _scale_bias_relu(y1, s1, c1, tile)                # Pallas finalize (bf16)

    # ---------- conv2 (3x3, s=1, pad=1) + bn2 ; downsample 1x1 + bn_d ; add ; relu ----------
    out1_nhwc = out1[:rows, :planes].reshape(N, Ho, Wo, planes)
    p2, _ = im2col_3x3(out1_nhwc, 1)
    k2 = _round_up(9 * planes, LANE)
    p2 = _pad2(p2, rows_p, k2).astype(jnp.bfloat16)
    w2_mat = _pad2(jnp.transpose(w2, (2, 3, 1, 0)).reshape(9 * planes, planes),
                   k2, cp).astype(jnp.bfloat16)

    xd = x[:, ::stride, ::stride, :].reshape(rows, Cin)
    kd = _round_up(Cin, LANE)
    xd = _pad2(xd, rows_p, kd).astype(jnp.bfloat16)
    wd_mat = _pad2(jnp.transpose(wd[:, :, 0, 0], (1, 0)), kd, cp).astype(jnp.bfloat16)

    y2, yd, mom2, momd = _dual_matmul_moments(p2, w2_mat, xd, wd_mat, tile)
    s2, c2 = _bn_scale_bias(mom2, rows, params["g2"], params["b2"], cp)
    sd, cd = _bn_scale_bias(momd, rows, params["gd"], params["bd"], cp)

    out = _residual_finalize(y2, yd, s2, sd, c2 + cd, tile)  # fused add + relu

    out_nhwc = out[:rows, :planes].reshape(N, Ho, Wo, planes)
    return jnp.transpose(out_nhwc, (0, 3, 1, 2))             # NHWC -> NCHW


# ------------------------- reference (pure JAX) ----------------------------- #

def reference_forward(x, params, stride):
    def conv(x, w, s, p):
        return jax.lax.conv_general_dilated(
            x, w, window_strides=(s, s), padding=((p, p), (p, p)),
            dimension_numbers=("NCHW", "OIHW", "NCHW"),
            precision=jax.lax.Precision.HIGHEST)

    def bn(x, g, b):
        mean = jnp.mean(x, axis=(0, 2, 3), keepdims=True)
        var = jnp.mean(jnp.square(x - mean), axis=(0, 2, 3), keepdims=True)
        return ((x - mean) * jax.lax.rsqrt(var + EPS)
                * g.reshape(1, -1, 1, 1) + b.reshape(1, -1, 1, 1))

    o = jax.nn.relu(bn(conv(x, params["w1"] * params["mask1"], stride, 1),
                       params["g1"], params["b1"]))
    o = bn(conv(o, params["w2"] * params["mask2"], 1, 1),
           params["g2"], params["b2"])
    d = bn(conv(x, params["wd"] * params["maskd"], stride, 0),
           params["gd"], params["bd"])
    return jax.nn.relu(o + d)


# ------------------------------ param init ---------------------------------- #

def init_params(key, in_planes, planes):
    ks = jax.random.split(key, 10)

    def kaiming_uniform(k, shape, fan_in):
        bound = 1.0 / np.sqrt(fan_in)
        return jax.random.uniform(k, shape, jnp.float32, -bound, bound)

    w1 = kaiming_uniform(ks[0], (planes, in_planes, 3, 3), in_planes * 9)
    w2 = kaiming_uniform(ks[1], (planes, planes, 3, 3), planes * 9)
    wd = kaiming_uniform(ks[2], (planes, in_planes, 1, 1), in_planes)
    return dict(
        w1=w1, w2=w2, wd=wd,
        mask1=jnp.ones_like(w1), mask2=jnp.ones_like(w2), maskd=jnp.ones_like(wd),
        g1=jax.random.uniform(ks[3], (planes,), jnp.float32, 0.5, 1.5),
        b1=0.1 * jax.random.normal(ks[4], (planes,), jnp.float32),
        g2=jax.random.uniform(ks[5], (planes,), jnp.float32, 0.5, 1.5),
        b2=0.1 * jax.random.normal(ks[6], (planes,), jnp.float32),
        gd=jax.random.uniform(ks[7], (planes,), jnp.float32, 0.5, 1.5),
        bd=0.1 * jax.random.normal(ks[8], (planes,), jnp.float32),
    )


if __name__ == "__main__":
    key = jax.random.PRNGKey(0)
    kx, kp = jax.random.split(key)

    N, Cin, H, W = 2, 4, 16, 16
    planes, stride = 8, 2            # stride!=1 and in_planes!=planes -> option 'B' path

    x = jax.random.normal(kx, (N, Cin, H, W), jnp.float32)
    params = init_params(kp, Cin, planes)

    out = jax.block_until_ready(basic_block_forward(x, params, stride))
    ref = reference_forward(x, params, stride)

    assert out.shape == (N, planes, H // stride, W // stride)
    assert np.all(np.isfinite(np.asarray(out)))
    # bf16 MXU operands (f32 accumulation) -> compare with a bf16-aware tolerance.
    np.testing.assert_allclose(np.asarray(out), np.asarray(ref), atol=4e-2, rtol=4e-2)

    print("KERNEL_OK")
</pallas_src>

<mosaic_0001>
module attributes {stable_mosaic.version = 11 : i64} {
  func.func @scale_bias_relu_kernel(%arg0: i32, %arg1: memref<128x128xf32, #tpu.memory_space<vmem>>, %arg2: memref<1x128xf32, #tpu.memory_space<vmem>>, %arg3: memref<1x128xf32, #tpu.memory_space<vmem>>, %arg4: memref<128x128xbf16, #tpu.memory_space<vmem>>) attributes {dimension_semantics = [#tpu.dimension_semantics<parallel>], iteration_bounds = array<i64: 1>, scalar_prefetch = 0 : i64, scratch_operands = 0 : i64, tpu.core_type = #tpu.core_type<tc>, window_params = [{transform_indices = @transform_0, window_bounds = array<i64: 128, 128>}, {pipeline_mode = #tpu.pipeline_mode<synchronous>, transform_indices = @transform_1, window_bounds = array<i64: 1, 128>}, {pipeline_mode = #tpu.pipeline_mode<synchronous>, transform_indices = @transform_2, window_bounds = array<i64: 1, 128>}, {transform_indices = @transform_3, window_bounds = array<i64: 128, 128>}]} {
    %c0 = arith.constant 0 : index
    %c0_0 = arith.constant 0 : index
    %0 = vector.load %arg1[%c0, %c0_0] : memref<128x128xf32, #tpu.memory_space<vmem>>, vector<128x128xf32>
    %c0_1 = arith.constant 0 : index
    %c0_2 = arith.constant 0 : index
    %1 = vector.load %arg2[%c0_1, %c0_2] : memref<1x128xf32, #tpu.memory_space<vmem>>, vector<1x128xf32>
    %2 = vector.broadcast %1 : vector<1x128xf32> to vector<128x128xf32>
    %3 = arith.mulf %0, %2 : vector<128x128xf32>
    %c0_3 = arith.constant 0 : index
    %c0_4 = arith.constant 0 : index
    %4 = vector.load %arg3[%c0_3, %c0_4] : memref<1x128xf32, #tpu.memory_space<vmem>>, vector<1x128xf32>
    %5 = vector.broadcast %4 : vector<1x128xf32> to vector<128x128xf32>
    %6 = arith.addf %3, %5 : vector<128x128xf32>
    %cst = arith.constant 0.000000e+00 : f32
    %7 = vector.broadcast %cst : f32 to vector<128x128xf32>
    %8 = arith.maximumf %6, %7 : vector<128x128xf32>
    %9 = arith.truncf %8 : vector<128x128xf32> to vector<128x128xbf16>
    %c0_5 = arith.constant 0 : index
    %c0_6 = arith.constant 0 : index
    %10 = vector.load %arg4[%c0_5, %c0_6] : memref<128x128xbf16, #tpu.memory_space<vmem>>, vector<128x128xbf16>
    tpu.vector_store %arg4[%c0_5, %c0_6], %9 {strides = array<i32>} : memref<128x128xbf16, #tpu.memory_space<vmem>>, vector<128x128xbf16>,
    return
  }
  func.func @transform_0(%arg0: i32) -> (i32, i32) {
    %c0_i32 = arith.constant 0 : i32
    %c0_i32_0 = arith.constant 0 : i32
    return %arg0, %c0_i32 : i32, i32
  }
  func.func @transform_1(%arg0: i32) -> (i32, i32) {
    %c0_i32 = arith.constant 0 : i32
    %c0_i32_0 = arith.constant 0 : i32
    %c0_i32_1 = arith.constant 0 : i32
    return %c0_i32, %c0_i32_0 : i32, i32
  }
  func.func @transform_2(%arg0: i32) -> (i32, i32) {
    %c0_i32 = arith.constant 0 : i32
    %c0_i32_0 = arith.constant 0 : i32
    %c0_i32_1 = arith.constant 0 : i32
    return %c0_i32, %c0_i32_0 : i32, i32
  }
  func.func @transform_3(%arg0: i32) -> (i32, i32) {
    %c0_i32 = arith.constant 0 : i32
    %c0_i32_0 = arith.constant 0 : i32
    return %arg0, %c0_i32 : i32, i32
  }
}

module attributes {stable_mosaic.version = 11 : i64} {
  func.func @matmul_moments_kernel(%arg0: i32, %arg1: memref<128x128xbf16, #tpu.memory_space<vmem>>, %arg2: memref<128x128xbf16, #tpu.memory_space<vmem>>, %arg3: memref<128x128xf32, #tpu.memory_space<vmem>>, %arg4: memref<1x8x128xf32, #tpu.memory_space<vmem>>) attributes {dimension_semantics = [#tpu.dimension_semantics<parallel>], iteration_bounds = array<i64: 1>, scalar_prefetch = 0 : i64, scratch_operands = 0 : i64, tpu.core_type = #tpu.core_type<tc>, window_params = [{transform_indices = @transform_0, window_bounds = array<i64: 128, 128>}, {pipeline_mode = #tpu.pipeline_mode<synchronous>, transform_indices = @transform_1, window_bounds = array<i64: 128, 128>}, {transform_indices = @transform_2, window_bounds = array<i64: 128, 128>}, {transform_indices = @transform_3, window_bounds = array<i64: 1, 8, 128>}]} {
    %c0 = arith.constant 0 : index
    %c0_0 = arith.constant 0 : index
    %0 = vector.load %arg1[%c0, %c0_0] : memref<128x128xbf16, #tpu.memory_space<vmem>>, vector<128x128xbf16>
    %c0_1 = arith.constant 0 : index
    %c0_2 = arith.constant 0 : index
    %1 = vector.load %arg2[%c0_1, %c0_2] : memref<128x128xbf16, #tpu.memory_space<vmem>>, vector<128x128xbf16>
    %cst = arith.constant dense<0.000000e+00> : vector<128x128xf32>
    %2 = tpu.matmul %0, %1, %cst {dimension_numbers = #tpu.dot_dimension_numbers<[1], [0], [0], [1], [0, 0, 1, 1], [], []>} : vector<128x128xbf16>, vector<128x128xbf16>, vector<128x128xf32> -> vector<128x128xf32>
    %c0_3 = arith.constant 0 : index
    %c0_4 = arith.constant 0 : index
    %3 = vector.load %arg3[%c0_3, %c0_4] : memref<128x128xf32, #tpu.memory_space<vmem>>, vector<128x128xf32>
    tpu.vector_store %arg3[%c0_3, %c0_4], %2 {strides = array<i32>} : memref<128x128xf32, #tpu.memory_space<vmem>>, vector<128x128xf32>,
    %cst_5 = arith.constant dense<0.000000e+00> : vector<128xf32>
    %4 = vector.multi_reduction <add>, %2, %cst_5 [0] : vector<128x128xf32> to vector<128xf32>
    %5 = vector.shape_cast %4 : vector<128xf32> to vector<1x128xf32>
    %6 = arith.mulf %2, %2 : vector<128x128xf32>
    %cst_6 = arith.constant dense<0.000000e+00> : vector<128xf32>
    %7 = vector.multi_reduction <add>, %6, %cst_6 [0] : vector<128x128xf32> to vector<128xf32>
    %8 = vector.shape_cast %7 : vector<128xf32> to vector<1x128xf32>
    %cst_7 = arith.constant 0.000000e+00 : f32
    %9 = vector.broadcast %cst_7 : f32 to vector<1x128xf32>
    %10 = tpu.concatenate %5, %8, %9, %9, %9, %9, %9, %9 in 0 : vector<1x128xf32>, vector<1x128xf32>, vector<1x128xf32>, vector<1x128xf32>, vector<1x128xf32>, vector<1x128xf32>, vector<1x128xf32>, vector<1x128xf32> -> vector<8x128xf32>
    %c0_8 = arith.constant 0 : index
    %c0_9 = arith.constant 0 : index
    %c0_10 = arith.constant 0 : index
    %11 = vector.load %arg4[%c0_8, %c0_9, %c0_10] : memref<1x8x128xf32, #tpu.memory_space<vmem>>, vector<1x8x128xf32>
    %12 = vector.shape_cast %11 : vector<1x8x128xf32> to vector<8x128xf32>
    %13 = vector.shape_cast %10 : vector<8x128xf32> to vector<1x8x128xf32>
    tpu.vector_store %arg4[%c0_8, %c0_9, %c0_10], %13 {strides = array<i32>} : memref<1x8x128xf32, #tpu.memory_space<vmem>>, vector<1x8x128xf32>,
    return
  }
  func.func @transform_0(%arg0: i32) -> (i32, i32) {
    %c0_i32 = arith.constant 0 : i32
    %c0_i32_0 = arith.constant 0 : i32
    return %arg0, %c0_i32 : i32, i32
  }
  func.func @transform_1(%arg0: i32) -> (i32, i32) {
    %c0_i32 = arith.constant 0 : i32
    %c0_i32_0 = arith.constant 0 : i32
    %c0_i32_1 = arith.constant 0 : i32
    return %c0_i32, %c0_i32_0 : i32, i32
  }
  func.func @transform_2(%arg0: i32) -> (i32, i32) {
    %c0_i32 = arith.constant 0 : i32
    %c0_i32_0 = arith.constant 0 : i32
    return %arg0, %c0_i32 : i32, i32
  }
  func.func @transform_3(%arg0: i32) -> (i32, i32, i32) {
    %c0_i32 = arith.constant 0 : i32
    %c0_i32_0 = arith.constant 0 : i32
    %c0_i32_1 = arith.constant 0 : i32
    return %arg0, %c0_i32, %c0_i32_0 : i32, i32, i32
  }
}

module attributes {stable_mosaic.version = 11 : i64} {
  func.func @residual_scale_bias_relu_kernel(%arg0: i32, %arg1: memref<128x128xf32, #tpu.memory_space<vmem>>, %arg2: memref<128x128xf32, #tpu.memory_space<vmem>>, %arg3: memref<1x128xf32, #tpu.memory_space<vmem>>, %arg4: memref<1x128xf32, #tpu.memory_space<vmem>>, %arg5: memref<1x128xf32, #tpu.memory_space<vmem>>, %arg6: memref<128x128xf32, #tpu.memory_space<vmem>>) attributes {dimension_semantics = [#tpu.dimension_semantics<parallel>], iteration_bounds = array<i64: 1>, scalar_prefetch = 0 : i64, scratch_operands = 0 : i64, tpu.core_type = #tpu.core_type<tc>, window_params = [{transform_indices = @transform_0, window_bounds = array<i64: 128, 128>}, {transform_indices = @transform_1, window_bounds = array<i64: 128, 128>}, {pipeline_mode = #tpu.pipeline_mode<synchronous>, transform_indices = @transform_2, window_bounds = array<i64: 1, 128>}, {pipeline_mode = #tpu.pipeline_mode<synchronous>, transform_indices = @transform_3, window_bounds = array<i64: 1, 128>}, {pipeline_mode = #tpu.pipeline_mode<synchronous>, transform_indices = @transform_4, window_bounds = array<i64: 1, 128>}, {transform_indices = @transform_5, window_bounds = array<i64: 128, 128>}]} {
    %c0 = arith.constant 0 : index
    %c0_0 = arith.constant 0 : index
    %0 = vector.load %arg1[%c0, %c0_0] : memref<128x128xf32, #tpu.memory_space<vmem>>, vector<128x128xf32>
    %c0_1 = arith.constant 0 : index
    %c0_2 = arith.constant 0 : index
    %1 = vector.load %arg3[%c0_1, %c0_2] : memref<1x128xf32, #tpu.memory_space<vmem>>, vector<1x128xf32>
    %2 = vector.broadcast %1 : vector<1x128xf32> to vector<128x128xf32>
    %3 = arith.mulf %0, %2 : vector<128x128xf32>
    %c0_3 = arith.constant 0 : index
    %c0_4 = arith.constant 0 : index
    %4 = vector.load %arg2[%c0_3, %c0_4] : memref<128x128xf32, #tpu.memory_space<vmem>>, vector<128x128xf32>
    %c0_5 = arith.constant 0 : index
    %c0_6 = arith.constant 0 : index
    %5 = vector.load %arg4[%c0_5, %c0_6] : memref<1x128xf32, #tpu.memory_space<vmem>>, vector<1x128xf32>
    %6 = vector.broadcast %5 : vector<1x128xf32> to vector<128x128xf32>
    %7 = arith.mulf %4, %6 : vector<128x128xf32>
    %8 = arith.addf %3, %7 : vector<128x128xf32>
    %c0_7 = arith.constant 0 : index
    %c0_8 = arith.constant 0 : index
    %9 = vector.load %arg5[%c0_7, %c0_8] : memref<1x128xf32, #tpu.memory_space<vmem>>, vector<1x128xf32>
    %10 = vector.broadcast %9 : vector<1x128xf32> to vector<128x128xf32>
    %11 = arith.addf %8, %10 : vector<128x128xf32>
    %cst = arith.constant 0.000000e+00 : f32
    %12 = vector.broadcast %cst : f32 to vector<128x128xf32>
    %13 = arith.maximumf %11, %12 : vector<128x128xf32>
    %c0_9 = arith.constant 0 : index
    %c0_10 = arith.constant 0 : index
    %14 = vector.load %arg6[%c0_9, %c0_10] : memref<128x128xf32, #tpu.memory_space<vmem>>, vector<128x128xf32>
    tpu.vector_store %arg6[%c0_9, %c0_10], %13 {strides = array<i32>} : memref<128x128xf32, #tpu.memory_space<vmem>>, vector<128x128xf32>,
    return
  }
  func.func @transform_0(%arg0: i32) -> (i32, i32) {
    %c0_i32 = arith.constant 0 : i32
    %c0_i32_0 = arith.constant 0 : i32
    return %arg0, %c0_i32 : i32, i32
  }
  func.func @transform_1(%arg0: i32) -> (i32, i32) {
    %c0_i32 = arith.constant 0 : i32
    %c0_i32_0 = arith.constant 0 : i32
    return %arg0, %c0_i32 : i32, i32
  }
  func.func @transform_2(%arg0: i32) -> (i32, i32) {
    %c0_i32 = arith.constant 0 : i32
    %c0_i32_0 = arith.constant 0 : i32
    %c0_i32_1 = arith.constant 0 : i32
    return %c0_i32, %c0_i32_0 : i32, i32
  }
  func.func @transform_3(%arg0: i32) -> (i32, i32) {
    %c0_i32 = arith.constant 0 : i32
    %c0_i32_0 = arith.constant 0 : i32
    %c0_i32_1 = arith.constant 0 : i32
    return %c0_i32, %c0_i32_0 : i32, i32
  }
  func.func @transform_4(%arg0: i32) -> (i32, i32) {
    %c0_i32 = arith.constant 0 : i32
    %c0_i32_0 = arith.constant 0 : i32
    %c0_i32_1 = arith.constant 0 : i32
    return %c0_i32, %c0_i32_0 : i32, i32
  }
  func.func @transform_5(%arg0: i32) -> (i32, i32) {
    %c0_i32 = arith.constant 0 : i32
    %c0_i32_0 = arith.constant 0 : i32
    return %arg0, %c0_i32 : i32, i32
  }
}

module attributes {stable_mosaic.version = 11 : i64} {
  func.func @dual_matmul_moments_kernel(%arg0: i32, %arg1: memref<128x128xbf16, #tpu.memory_space<vmem>>, %arg2: memref<128x128xbf16, #tpu.memory_space<vmem>>, %arg3: memref<128x128xbf16, #tpu.memory_space<vmem>>, %arg4: memref<128x128xbf16, #tpu.memory_space<vmem>>, %arg5: memref<128x128xf32, #tpu.memory_space<vmem>>, %arg6: memref<128x128xf32, #tpu.memory_space<vmem>>, %arg7: memref<1x8x128xf32, #tpu.memory_space<vmem>>, %arg8: memref<1x8x128xf32, #tpu.memory_space<vmem>>) attributes {dimension_semantics = [#tpu.dimension_semantics<parallel>], iteration_bounds = array<i64: 1>, scalar_prefetch = 0 : i64, scratch_operands = 0 : i64, tpu.core_type = #tpu.core_type<tc>, window_params = [{transform_indices = @transform_0, window_bounds = array<i64: 128, 128>}, {pipeline_mode = #tpu.pipeline_mode<synchronous>, transform_indices = @transform_1, window_bounds = array<i64: 128, 128>}, {transform_indices = @transform_2, window_bounds = array<i64: 128, 128>}, {pipeline_mode = #tpu.pipeline_mode<synchronous>, transform_indices = @transform_3, window_bounds = array<i64: 128, 128>}, {transform_indices = @transform_4, window_bounds = array<i64: 128, 128>}, {transform_indices = @transform_5, window_bounds = array<i64: 128, 128>}, {transform_indices = @transform_6, window_bounds = array<i64: 1, 8, 128>}, {transform_indices = @transform_7, window_bounds = array<i64: 1, 8, 128>}]} {
    %c0 = arith.constant 0 : index
    %c0_0 = arith.constant 0 : index
    %0 = vector.load %arg1[%c0, %c0_0] : memref<128x128xbf16, #tpu.memory_space<vmem>>, vector<128x128xbf16>
    %c0_1 = arith.constant 0 : index
    %c0_2 = arith.constant 0 : index
    %1 = vector.load %arg2[%c0_1, %c0_2] : memref<128x128xbf16, #tpu.memory_space<vmem>>, vector<128x128xbf16>
    %cst = arith.constant dense<0.000000e+00> : vector<128x128xf32>
    %2 = tpu.matmul %0, %1, %cst {dimension_numbers = #tpu.dot_dimension_numbers<[1], [0], [0], [1], [0, 0, 1, 1], [], []>} : vector<128x128xbf16>, vector<128x128xbf16>, vector<128x128xf32> -> vector<128x128xf32>
    %c0_3 = arith.constant 0 : index
    %c0_4 = arith.constant 0 : index
    %3 = vector.load %arg3[%c0_3, %c0_4] : memref<128x128xbf16, #tpu.memory_space<vmem>>, vector<128x128xbf16>
    %c0_5 = arith.constant 0 : index
    %c0_6 = arith.constant 0 : index
    %4 = vector.load %arg4[%c0_5, %c0_6] : memref<128x128xbf16, #tpu.memory_space<vmem>>, vector<128x128xbf16>
    %cst_7 = arith.constant dense<0.000000e+00> : vector<128x128xf32>
    %5 = tpu.matmul %3, %4, %cst_7 {dimension_numbers = #tpu.dot_dimension_numbers<[1], [0], [0], [1], [0, 0, 1, 1], [], []>} : vector<128x128xbf16>, vector<128x128xbf16>, vector<128x128xf32> -> vector<128x128xf32>
    %c0_8 = arith.constant 0 : index
    %c0_9 = arith.constant 0 : index
    %6 = vector.load %arg5[%c0_8, %c0_9] : memref<128x128xf32, #tpu.memory_space<vmem>>, vector<128x128xf32>
    tpu.vector_store %arg5[%c0_8, %c0_9], %2 {strides = array<i32>} : memref<128x128xf32, #tpu.memory_space<vmem>>, vector<128x128xf32>,
    %c0_10 = arith.constant 0 : index
    %c0_11 = arith.constant 0 : index
    %7 = vector.load %arg6[%c0_10, %c0_11] : memref<128x128xf32, #tpu.memory_space<vmem>>, vector<128x128xf32>
    tpu.vector_store %arg6[%c0_10, %c0_11], %5 {strides = array<i32>} : memref<128x128xf32, #tpu.memory_space<vmem>>, vector<128x128xf32>,
    %cst_12 = arith.constant dense<0.000000e+00> : vector<128xf32>
    %8 = vector.multi_reduction <add>, %2, %cst_12 [0] : vector<128x128xf32> to vector<128xf32>
    %9 = vector.shape_cast %8 : vector<128xf32> to vector<1x128xf32>
    %10 = arith.mulf %2, %2 : vector<128x128xf32>
    %cst_13 = arith.constant dense<0.000000e+00> : vector<128xf32>
    %11 = vector.multi_reduction <add>, %10, %cst_13 [0] : vector<128x128xf32> to vector<128xf32>
    %12 = vector.shape_cast %11 : vector<128xf32> to vector<1x128xf32>
    %cst_14 = arith.constant 0.000000e+00 : f32
    %13 = vector.broadcast %cst_14 : f32 to vector<1x128xf32>
    %14 = tpu.concatenate %9, %12, %13, %13, %13, %13, %13, %13 in 0 : vector<1x128xf32>, vector<1x128xf32>, vector<1x128xf32>, vector<1x128xf32>, vector<1x128xf32>, vector<1x128xf32>, vector<1x128xf32>, vector<1x128xf32> -> vector<8x128xf32>
    %c0_15 = arith.constant 0 : index
    %c0_16 = arith.constant 0 : index
    %c0_17 = arith.constant 0 : index
    %15 = vector.load %arg7[%c0_15, %c0_16, %c0_17] : memref<1x8x128xf32, #tpu.memory_space<vmem>>, vector<1x8x128xf32>
    %16 = vector.shape_cast %15 : vector<1x8x128xf32> to vector<8x128xf32>
    %17 = vector.shape_cast %14 : vector<8x128xf32> to vector<1x8x128xf32>
    tpu.vector_store %arg7[%c0_15, %c0_16, %c0_17], %17 {strides = array<i32>} : memref<1x8x128xf32, #tpu.memory_space<vmem>>, vector<1x8x128xf32>,
    %cst_18 = arith.constant dense<0.000000e+00> : vector<128xf32>
    %18 = vector.multi_reduction <add>, %5, %cst_18 [0] : vector<128x128xf32> to vector<128xf32>
    %19 = vector.shape_cast %18 : vector<128xf32> to vector<1x128xf32>
    %20 = arith.mulf %5, %5 : vector<128x128xf32>
    %cst_19 = arith.constant dense<0.000000e+00> : vector<128xf32>
    %21 = vector.multi_reduction <add>, %20, %cst_19 [0] : vector<128x128xf32> to vector<128xf32>
    %22 = vector.shape_cast %21 : vector<128xf32> to vector<1x128xf32>
    %cst_20 = arith.constant 0.000000e+00 : f32
    %23 = vector.broadcast %cst_20 : f32 to vector<1x128xf32>
    %24 = tpu.concatenate %19, %22, %23, %23, %23, %23, %23, %23 in 0 : vector<1x128xf32>, vector<1x128xf32>, vector<1x128xf32>, vector<1x128xf32>, vector<1x128xf32>, vector<1x128xf32>, vector<1x128xf32>, vector<1x128xf32> -> vector<8x128xf32>
    %c0_21 = arith.constant 0 : index
    %c0_22 = arith.constant 0 : index
    %c0_23 = arith.constant 0 : index
    %25 = vector.load %arg8[%c0_21, %c0_22, %c0_23] : memref<1x8x128xf32, #tpu.memory_space<vmem>>, vector<1x8x128xf32>
    %26 = vector.shape_cast %25 : vector<1x8x128xf32> to vector<8x128xf32>
    %27 = vector.shape_cast %24 : vector<8x128xf32> to vector<1x8x128xf32>
    tpu.vector_store %arg8[%c0_21, %c0_22, %c0_23], %27 {strides = array<i32>} : memref<1x8x128xf32, #tpu.memory_space<vmem>>, vector<1x8x128xf32>,
    return
  }
  func.func @transform_0(%arg0: i32) -> (i32, i32) {
    %c0_i32 = arith.constant 0 : i32
    %c0_i32_0 = arith.constant 0 : i32
    return %arg0, %c0_i32 : i32, i32
  }
  func.func @transform_1(%arg0: i32) -> (i32, i32) {
    %c0_i32 = arith.constant 0 : i32
    %c0_i32_0 = arith.constant 0 : i32
    %c0_i32_1 = arith.constant 0 : i32
    return %c0_i32, %c0_i32_0 : i32, i32
  }
  func.func @transform_2(%arg0: i32) -> (i32, i32) {
    %c0_i32 = arith.constant 0 : i32
    %c0_i32_0 = arith.constant 0 : i32
    return %arg0, %c0_i32 : i32, i32
  }
  func.func @transform_3(%arg0: i32) -> (i32, i32) {
    %c0_i32 = arith.constant 0 : i32
    %c0_i32_0 = arith.constant 0 : i32
    %c0_i32_1 = arith.constant 0 : i32
    return %c0_i32, %c0_i32_0 : i32, i32
  }
  func.func @transform_4(%arg0: i32) -> (i32, i32) {
    %c0_i32 = arith.constant 0 : i32
    %c0_i32_0 = arith.constant 0 : i32
    return %arg0, %c0_i32 : i32, i32
  }
  func.func @transform_5(%arg0: i32) -> (i32, i32) {
    %c0_i32 = arith.constant 0 : i32
    %c0_i32_0 = arith.constant 0 : i32
    return %arg0, %c0_i32 : i32, i32
  }
  func.func @transform_6(%arg0: i32) -> (i32, i32, i32) {
    %c0_i32 = arith.constant 0 : i32
    %c0_i32_0 = arith.constant 0 : i32
    %c0_i32_1 = arith.constant 0 : i32
    return %arg0, %c0_i32, %c0_i32_0 : i32, i32, i32
  }
  func.func @transform_7(%arg0: i32) -> (i32, i32, i32) {
    %c0_i32 = arith.constant 0 : i32
    %c0_i32_0 = arith.constant 0 : i32
    %c0_i32_1 = arith.constant 0 : i32
    return %arg0, %c0_i32, %c0_i32_0 : i32, i32, i32
  }
}

</mosaic_0001>

<bundles_post_ra>
// kernel: basic_block_forward.5
= control target key start
LH: loop header
LB: loop body
LE: loop exit
PB: predicated region body
PF: predicated region fallthrough
CT: control target
= control target key end

     0   :  { %s391_s0 = inlined_call_operand.vmem [shape: f32[128,128], index: 0, kind: input, shape index: {}]   ;;  %s392_s1 = inlined_call_operand.vmem [shape: f32[1,128], index: 1, kind: input, shape index: {}]   ;;  %s393_s2 = inlined_call_operand.vmem [shape: f32[1,128], index: 2, kind: input, shape index: {}]   ;;  %s394_s3 = inlined_call_operand.vmem [shape: bf16[128,128], index: 3, kind: output, shape index: {}]  }
   0x1   :  { %v14_v0 = vld [vmem:[%s391_s0] sm:$0xff]  ;;  %v15_v1 = vld [vmem:[%s391_s0 + $0x8] sm:$0xff]  ;;  %v16_v6 = vld [vmem:[%s391_s0 + $0x10] sm:$0xff] }
   0x2   :  { %v286_v2 = vld [vmem:[%s392_s1] ss:$0 sm:$0xff]  ;;  %v17_v7 = vld [vmem:[%s391_s0 + $0x18] sm:$0xff]  ;;  %v19_v11 = vld [vmem:[%s391_s0 + $0x28] sm:$0xff] }
   0x3   :  { %v37_v3 = vmul.f32 %v286_v2, %v14_v0  ;;  %v38_v4 = vmul.f32 %v286_v2, %v15_v1  ;;  %v293_v5 = vld [vmem:[%s393_s2] ss:$0 sm:$0xff]  ;;  %v39_v8 = vmul.f32 %v286_v2, %v16_v6  ;;  %v40_v9 = vmul.f32 %v286_v2, %v17_v7  ;;  %v20_v12 = vld [vmem:[%s391_s0 + $0x30] sm:$0xff]  ;;  %v21_v17 = vld [vmem:[%s391_s0 + $0x38] sm:$0xff] }
   0x4   :  { %v18_v10 = vld [vmem:[%s391_s0 + $0x20] sm:$0xff]  ;;  %v42_v16 = vmul.f32 %v286_v2, %v19_v11  ;;  %v43_v20 = vmul.f32 %v286_v2, %v20_v12  ;;  %v44_v21 = vmul.f32 %v286_v2, %v21_v17  ;;  %v23_v27 = vld [vmem:[%s391_s0 + $0x48] sm:$0xff]  ;;  %v24_v32 = vld [vmem:[%s391_s0 + $0x50] sm:$0xff] }
   0x5   :  { %v60_v13 = vadd.f32 %v293_v5, %v37_v3  ;;  %v61_v14 = vadd.f32 %v293_v5, %v38_v4  ;;  %v41_v15 = vmul.f32 %v286_v2, %v18_v10  ;;  %v62_v18 = vadd.f32 %v293_v5, %v39_v8  ;;  %v22_v22 = vld [vmem:[%s391_s0 + $0x40] sm:$0xff]  ;;  %v25_v33 = vld [vmem:[%s391_s0 + $0x58] sm:$0xff]  ;;  %v27_v39 = vld [vmem:[%s391_s0 + $0x68] sm:$0xff] }
   0x6   :  { %v63_v19 = vadd.f32 %v293_v5, %v40_v9  ;;  %v65_v26 = vadd.f32 %v293_v5, %v42_v16  ;;  %v66_v30 = vadd.f32 %v293_v5, %v43_v20  ;;  %v67_v31 = vadd.f32 %v293_v5, %v44_v21  ;;  %v26_v38 = vld [vmem:[%s391_s0 + $0x60] sm:$0xff]  ;;  %v28_v44 = vld [vmem:[%s391_s0 + $0x70] sm:$0xff]  ;;  %v29_v49 = vld [vmem:[%s391_s0 + $0x78] sm:$0xff] }
   0x7   :  { %v76_v23 = vmax.f32 %v60_v13, 0.0  ;;  %v77_v24 = vmax.f32 %v61_v14, 0.0  ;;  %v64_v25 = vadd.f32 %v293_v5, %v41_v15  ;;  %v78_v28 = vmax.f32 %v62_v18, 0.0 }
   0x8   :  { %v79_v29 = vmax.f32 %v63_v19, 0.0  ;;  %v81_v36 = vmax.f32 %v65_v26, 0.0  ;;  %v45_v37 = vmul.f32 %v286_v2, %v22_v22  ;;  %v82_v41 = vmax.f32 %v66_v30, 0.0 }
   0x9   :  { %v213_v34 = vpack.c.bf16 %v77_v24, %v76_v23  ;;  %v80_v35 = vmax.f32 %v64_v25, 0.0  ;;  %v83_v42 = vmax.f32 %v67_v31, 0.0  ;;  %v46_v43 = vmul.f32 %v286_v2, %v23_v27 }
   0xa   :  { %v218_v40 = vpack.c.bf16 %v79_v29, %v78_v28  ;;  %v68_v46 = vadd.f32 %v293_v5, %v45_v37  ;;  %v47_v47 = vmul.f32 %v286_v2, %v24_v32  ;;  %v48_v48 = vmul.f32 %v286_v2, %v25_v33 }
   0xb   :  { %214 = vst [vmem:[%s394_s3] sm:$0xff] %v213_v34   ;;  %v223_v45 = vpack.c.bf16 %v81_v36, %v80_v35  ;;  %v228_v50 = vpack.c.bf16 %v83_v42, %v82_v41  ;;  %v69_v51 = vadd.f32 %v293_v5, %v46_v43  ;;  %v49_v52 = vmul.f32 %v286_v2, %v26_v38 }
   0xc   :  { %250 = vst [vmem:[%s394_s3 + $0x8] sm:$0xff] %v218_v40   ;;  %v50_v53 = vmul.f32 %v286_v2, %v27_v39  ;;  %v84_v54 = vmax.f32 %v68_v46, 0.0  ;;  %v70_v55 = vadd.f32 %v293_v5, %v47_v47  ;;  %v71_v56 = vadd.f32 %v293_v5, %v48_v48 }
   0xd   :  { %251 = vst [vmem:[%s394_s3 + $0x10] sm:$0xff] %v223_v45   ;;  %v51_v57 = vmul.f32 %v286_v2, %v28_v44  ;;  %252 = vst [vmem:[%s394_s3 + $0x18] sm:$0xff] %v228_v50   ;;  %v85_v58 = vmax.f32 %v69_v51, 0.0  ;;  %v72_v59 = vadd.f32 %v293_v5, %v49_v52  ;;  %v52_v61 = vmul.f32 %v286_v2, %v29_v49 }
   0xe   :  { %v73_v60 = vadd.f32 %v293_v5, %v50_v53  ;;  %v86_v62 = vmax.f32 %v70_v55, 0.0  ;;  %v87_v63 = vmax.f32 %v71_v56, 0.0 }
   0xf   :  { %v74_v0 = vadd.f32 %v293_v5, %v51_v57  ;;  %v233_v1 = vpack.c.bf16 %v85_v58, %v84_v54  ;;  %v88_v3 = vmax.f32 %v72_v59, 0.0  ;;  %v75_v6 = vadd.f32 %v293_v5, %v52_v61 }
  0x10   :  { %v89_v4 = vmax.f32 %v73_v60, 0.0  ;;  %v238_v7 = vpack.c.bf16 %v87_v63, %v86_v62 }
  0x11   :  { %v90_v8 = vmax.f32 %v74_v0, 0.0  ;;  %253 = vst [vmem:[%s394_s3 + $0x20] sm:$0xff] %v233_v1   ;;  %v91_v10 = vmax.f32 %v75_v6, 0.0 }
  0x12   :  { %v243_v9 = vpack.c.bf16 %v89_v4, %v88_v3  ;;  %254 = vst [vmem:[%s394_s3 + $0x28] sm:$0xff] %v238_v7  }
  0x13   :  { %v248_v2 = vpack.c.bf16 %v91_v10, %v90_v8 }
  0x14   :  { %255 = vst [vmem:[%s394_s3 + $0x30] sm:$0xff] %v243_v9  }
  0x15   :  { %256 = vst [vmem:[%s394_s3 + $0x38] sm:$0xff] %v248_v2  }

// kernel: basic_block_forward.4
= control target key start
LH: loop header
LB: loop body
LE: loop exit
PB: predicated region body
PF: predicated region fallthrough
CT: control target
= control target key end

     0   :  { %vm313_vm0 = vcmask 1040384   ;;  %vm315_vm1 = vcmask 1041408   ;;  %vm317_vm2 = vcmask 1042432   ;;  %vm319_vm3 = vcmask 1043456   ;;  %s551_s1 = inlined_call_operand.vmem [shape: bf16[128,128], index: 1, kind: input, shape index: {}]   ;;  %s552_s0 = inlined_call_operand.vmem [shape: bf16[128,128], index: 0, kind: input, shape index: {}]   ;;  %s553_s2 = inlined_call_operand.vmem [shape: f32[128,128], index: 2, kind: output, shape index: {0}]   ;;  %s554_s3 = inlined_call_operand.vmem [shape: f32[1,8,128], index: 3, kind: output, shape index: {1}]  }
   0x1   :  { %v416_v0 = vld [vmem:[%s551_s1 + $0x38] sm:$0xff]   ;;  %v417_v1 = vld [vmem:[%s551_s1 + $0x30] sm:$0xff]   ;;  %v418_v2 = vld [vmem:[%s551_s1 + $0x28] sm:$0xff]   ;;  %vm321_vm4 = vcmask 1044480   ;;  %vm323_vm5 = vcmask 1045504   ;;  %vm325_vm6 = vcmask 1046528  }
   0x2   :  { %368 = vmatprep.subr.bf16.mxu0 %v416_v0  ;;  %400 = vmatprep.subr.bf16.mxu1 %v416_v0  ;;  %v419_v3 = vld [vmem:[%s551_s1 + $0x20] sm:$0xff]   ;;  %v420_v5 = vld [vmem:[%s551_s1 + $0x18] sm:$0xff]   ;;  %v421_v7 = vld [vmem:[%s551_s1 + $0x10] sm:$0xff]  }
   0x3   :  { %369 = vmatpush3.bf16.msra.mxu0 %v416_v0  ;;  %408 = vmatpush3.bf16.msra.mxu1 %v416_v0  ;;  %v424_v4 = vld [vmem:[%s552_s0] sm:$0xff]   ;;  %v422_v8 = vld [vmem:[%s551_s1 + $0x8] sm:$0xff]   ;;  %v426_v12 = vld [vmem:[%s552_s0 + $0x10] sm:$0xff]  }
   0x4   :  { %370 = vmatprep.subr.bf16.mxu0 %v417_v1  ;;  %401 = vmatprep.subr.bf16.mxu1 %v417_v1  ;;  %v428_v6 = vld [vmem:[%s552_s0 + $0x20] sm:$0xff]   ;;  %v425_v10 = vld [vmem:[%s552_s0 + $0x8] sm:$0xff]   ;;  %v430_v13 = vld [vmem:[%s552_s0 + $0x30] sm:$0xff]  }
   0x5   :  { %384 = vmatprep.mubr.bf16.mxu0 %v424_v4  ;;  %392 = vmatprep.mubr.bf16.mxu1 %v428_v6  ;;  %v423_v9 = vld [vmem:[%s551_s1] sm:$0xff]   ;;  %v429_v11 = vld [vmem:[%s552_s0 + $0x28] sm:$0xff]   ;;  %v427_v14 = vld [vmem:[%s552_s0 + $0x18] sm:$0xff]  }
   0x6   :  { %v431_v15 = vld [vmem:[%s552_s0 + $0x38] sm:$0xff]  }
   0x7   :  { %371 = vmatpush3.bf16.msra.mxu0 %v417_v1  ;;  %409 = vmatpush3.bf16.msra.mxu1 %v417_v1 }
   0x8   :  { %372 = vmatprep.subr.bf16.mxu0 %v418_v2  ;;  %402 = vmatprep.subr.bf16.mxu1 %v418_v2 }
   0xb   :  { %373 = vmatpush3.bf16.msra.mxu0 %v418_v2  ;;  %410 = vmatpush3.bf16.msra.mxu1 %v418_v2 }
   0xc   :  { %374 = vmatprep.subr.bf16.mxu0 %v419_v3  ;;  %403 = vmatprep.subr.bf16.mxu1 %v419_v3 }
   0xf   :  { %375 = vmatpush3.bf16.msra.mxu0 %v419_v3  ;;  %411 = vmatpush3.bf16.msra.mxu1 %v419_v3 }
  0x10   :  { %376 = vmatprep.subr.bf16.mxu0 %v420_v5  ;;  %404 = vmatprep.subr.bf16.mxu1 %v420_v5 }
  0x13   :  { %377 = vmatpush3.bf16.msra.mxu0 %v420_v5  ;;  %412 = vmatpush3.bf16.msra.mxu1 %v420_v5 }
  0x14   :  { %378 = vmatprep.subr.bf16.mxu0 %v421_v7  ;;  %405 = vmatprep.subr.bf16.mxu1 %v421_v7 }
  0x17   :  { %379 = vmatpush3.bf16.msra.mxu0 %v421_v7  ;;  %413 = vmatpush3.bf16.msra.mxu1 %v421_v7 }
  0x18   :  { %380 = vmatprep.subr.bf16.mxu0 %v422_v8  ;;  %406 = vmatprep.subr.bf16.mxu1 %v422_v8 }
  0x1b   :  { %381 = vmatpush3.bf16.msra.mxu0 %v422_v8  ;;  %414 = vmatpush3.bf16.msra.mxu1 %v422_v8 }
  0x1c   :  { %382 = vmatprep.subr.bf16.mxu0 %v423_v9  ;;  %407 = vmatprep.subr.bf16.mxu1 %v423_v9 }
  0x1f   :  { %383 = vmatpush3.bf16.msra.mxu0 %v423_v9  ;;  %415 = vmatpush3.bf16.msra.mxu1 %v423_v9 }
  0x22   :  { %385 = vmatmul.mubr.bf16.vlgmr.msra.gmra.mxu0 %v425_v10  ;;  %393 = vmatmul.mubr.bf16.vlgmr.msra.gmra.mxu1 %v429_v11 }
  0x23   :  { %388 = vmatprep.mubr.bf16.mxu0 %v426_v12  ;;  %396 = vmatprep.mubr.bf16.mxu1 %v430_v13 }
  0x2a   :  { %389 = vmatmul.mubr.bf16.gmra.mxu0 %v427_v14  ;;  %397 = vmatmul.mubr.bf16.gmra.mxu1 %v431_v15 }
  0xe2   :  { %v386_v16 = vpop.f32.mrf.mxu0  ;;  %v394_v17 = vpop.f32.mrf.mxu1 }
  0xe3   :  { %241 = vst [vmem:[%s553_s2 + $0x10] sm:$0xff] %v386_v16  ;;  %249 = vst [vmem:[%s553_s2 + $0x50] sm:$0xff] %v394_v17  ;;  %v278_v29 = vmul.f32 %v386_v16, %v386_v16  ;;  %v286_v59 = vmul.f32 %v394_v17, %v394_v17 }
  0xe4   :  { %v176_v18 = vpop.f32.mrf.mxu0  ;;  %v208_v19 = vpop.f32.mrf.mxu1 }
  0xe5   :  { %239 = vst [vmem:[%s553_s2] sm:$0xff] %v176_v18  ;;  %247 = vst [vmem:[%s553_s2 + $0x40] sm:$0xff] %v208_v19  ;;  %v276_v24 = vmul.f32 %v176_v18, %v176_v18  ;;  %v284_v53 = vmul.f32 %v208_v19, %v208_v19 }
  0xe6   :  { %v387_v20 = vpop.f32.mrf.mxu0  ;;  %v395_v21 = vpop.f32.mrf.mxu1 }
  0xe7   :  { %242 = vst [vmem:[%s553_s2 + $0x18] sm:$0xff] %v387_v20  ;;  %250 = vst [vmem:[%s553_s2 + $0x58] sm:$0xff] %v395_v21  ;;  %v279_v34 = vmul.f32 %v387_v20, %v387_v20  ;;  %v287_v62 = vmul.f32 %v395_v21, %v395_v21 }
  0xe8   :  { %v179_v22 = vpop.f32.mrf.mxu0  ;;  %v211_v23 = vpop.f32.mrf.mxu1 }
  0xe9   :  { %240 = vst [vmem:[%s553_s2 + $0x8] sm:$0xff] %v179_v22  ;;  %v255_v25 = vadd.f32 %v179_v22, %v176_v18  ;;  %v277_v26 = vmul.f32 %v179_v22, %v179_v22  ;;  %248 = vst [vmem:[%s553_s2 + $0x48] sm:$0xff] %v211_v23  ;;  %v285_v57 = vmul.f32 %v211_v23, %v211_v23 }
  0xea   :  { %v390_v27 = vpop.f32.mrf.mxu0  ;;  %v398_v28 = vpop.f32.mrf.mxu1 }
  0xeb   :  { %v256_v30 = vadd.f32 %v386_v16, %v255_v25  ;;  %v292_v31 = vadd.f32 %v277_v26, %v276_v24  ;;  %245 = vst [vmem:[%s553_s2 + $0x30] sm:$0xff] %v390_v27  ;;  %253 = vst [vmem:[%s553_s2 + $0x70] sm:$0xff] %v398_v28  ;;  %v282_v47 = vmul.f32 %v390_v27, %v390_v27 }
  0xec   :  { %v192_v32 = vpop.f32.mrf.mxu0  ;;  %v224_v33 = vpop.f32.mrf.mxu1  ;;  %v290_v7 = vmul.f32 %v398_v28, %v398_v28 }
  0xed   :  { %v293_v35 = vadd.f32 %v292_v31, %v278_v29  ;;  %243 = vst [vmem:[%s553_s2 + $0x20] sm:$0xff] %v192_v32  ;;  %v257_v36 = vadd.f32 %v387_v20, %v256_v30  ;;  %251 = vst [vmem:[%s553_s2 + $0x60] sm:$0xff] %v224_v33  ;;  %v280_v40 = vmul.f32 %v192_v32, %v192_v32 }
  0xee   :  { %v391_v37 = vpop.f32.mrf.mxu0  ;;  %v399_v38 = vpop.f32.mrf.mxu1  ;;  %v288_v2 = vmul.f32 %v224_v33, %v224_v33 }
  0xef   :  { %v258_v39 = vadd.f32 %v257_v36, %v192_v32  ;;  %v294_v41 = vadd.f32 %v293_v35, %v279_v34  ;;  %246 = vst [vmem:[%s553_s2 + $0x38] sm:$0xff] %v391_v37  ;;  %254 = vst [vmem:[%s553_s2 + $0x78] sm:$0xff] %v399_v38  ;;  %v283_v50 = vmul.f32 %v391_v37, %v391_v37 }
  0xf0   :  { %v195_v42 = vpop.f32.mrf.mxu0  ;;  %v227_v43 = vpop.f32.mrf.mxu1  ;;  %v291_v10 = vmul.f32 %v399_v38, %v399_v38 }
  0xf1   :  { %v295_v44 = vadd.f32 %v294_v41, %v280_v40  ;;  %244 = vst [vmem:[%s553_s2 + $0x28] sm:$0xff] %v195_v42  ;;  %v259_v45 = vadd.f32 %v258_v39, %v195_v42  ;;  %v281_v46 = vmul.f32 %v195_v42, %v195_v42  ;;  %252 = vst [vmem:[%s553_s2 + $0x68] sm:$0xff] %v227_v43 }
  0xf2   :  { %v289_v6 = vmul.f32 %v227_v43, %v227_v43 }
  0xf3   :  { %v260_v48 = vadd.f32 %v390_v27, %v259_v45  ;;  %v296_v49 = vadd.f32 %v295_v44, %v281_v46 }
  0xf5   :  { %v261_v51 = vadd.f32 %v391_v37, %v260_v48  ;;  %v297_v52 = vadd.f32 %v296_v49, %v282_v47 }
  0xf7   :  { %v298_v54 = vadd.f32 %v297_v52, %v283_v50  ;;  %v262_v55 = vadd.f32 %v261_v51, %v208_v19 }
  0xf9   :  { %v263_v56 = vadd.f32 %v262_v55, %v211_v23  ;;  %v299_v58 = vadd.f32 %v298_v54, %v284_v53 }
  0xfb   :  { %v264_v60 = vadd.f32 %v394_v17, %v263_v56  ;;  %v300_v61 = vadd.f32 %v299_v58, %v285_v57 }
  0xfd   :  { %v301_v63 = vadd.f32 %v300_v61, %v286_v59  ;;  %v265_v0 = vadd.f32 %v395_v21, %v264_v60 }
  0xff   :  { %v266_v1 = vadd.f32 %v265_v0, %v224_v33  ;;  %v302_v3 = vadd.f32 %v301_v63, %v287_v62 }
 0x101   :  { %v303_v4 = vadd.f32 %v302_v3, %v288_v2  ;;  %v267_v5 = vadd.f32 %v266_v1, %v227_v43 }
 0x103   :  { %v268_v8 = vadd.f32 %v398_v28, %v267_v5  ;;  %v304_v9 = vadd.f32 %v303_v4, %v289_v6 }
 0x105   :  { %v269_v11 = vadd.f32 %v399_v38, %v268_v8  ;;  %v305_v12 = vadd.f32 %v304_v9, %v290_v7 }
 0x107   :  { %v270_v13 = vrot.slane %v269_v11, 4  ;;  %v306_v14 = vadd.f32 %v305_v12, %v291_v10 }
 0x109   :  { %v271_v15 = vadd.f32 %v270_v13, %v269_v11  ;;  %v307_v16 = vrot.slane %v306_v14, 4 }
 0x10b   :  { %v272_v17 = vrot.slane %v271_v15, 2  ;;  %v308_v18 = vadd.f32 %v307_v16, %v306_v14 }
 0x10d   :  { %v273_v19 = vadd.f32 %v272_v17, %v271_v15  ;;  %v309_v20 = vrot.slane %v308_v18, 2 }
 0x10f   :  { %v274_v21 = vrot.slane %v273_v19, 1  ;;  %v310_v22 = vadd.f32 %v309_v20, %v308_v18 }
 0x111   :  { %v311_v23 = vrot.slane %v310_v22, 1  ;;  %v275_v24 = vadd.f32 %v274_v21, %v273_v19 }
 0x113   :  { %v312_v25 = vadd.f32 %v311_v23, %v310_v22 }
 0x115   :  { %v314_v26 = vsel %vm313_vm0, %v275_v24, %v312_v25 }
 0x116   :  { %v316_v27 = vsel %vm315_vm1, %v314_v26, 0.0 }
 0x117   :  { %v318_v28 = vsel %vm317_vm2, %v316_v27, 0.0 }
 0x118   :  { %v320_v29 = vsel %vm319_vm3, %v318_v28, 0.0 }
 0x119   :  { %v322_v30 = vsel %vm321_vm4, %v320_v29, 0.0 }
 0x11a   :  { %v324_v31 = vsel %vm323_vm5, %v322_v30, 0.0 }
 0x11b   :  { %v326_v32 = vsel %vm325_vm6, %v324_v31, 0.0 }
 0x11c   :  { %327 = vst [vmem:[%s554_s3] sm:$0xff] %v326_v32 }

// kernel: basic_block_forward.7
= control target key start
LH: loop header
LB: loop body
LE: loop exit
PB: predicated region body
PF: predicated region fallthrough
CT: control target
= control target key end

     0   :  { %s413_s0 = inlined_call_operand.vmem [shape: f32[128,128], index: 0, kind: input, shape index: {}]   ;;  %s414_s1 = inlined_call_operand.vmem [shape: f32[128,128], index: 1, kind: input, shape index: {}]   ;;  %s415_s2 = inlined_call_operand.vmem [shape: f32[1,128], index: 2, kind: input, shape index: {}]   ;;  %s416_s3 = inlined_call_operand.vmem [shape: f32[1,128], index: 3, kind: input, shape index: {}]   ;;  %s417_s4 = inlined_call_operand.vmem [shape: f32[1,128], index: 4, kind: input, shape index: {}]   ;;  %s418_s5 = inlined_call_operand.vmem [shape: f32[128,128], index: 5, kind: output, shape index: {}]  }
   0x1   :  { %v20_v0 = vld [vmem:[%s413_s0] sm:$0xff]  ;;  %v21_v6 = vld [vmem:[%s413_s0 + $0x8] sm:$0xff]  ;;  %v22_v10 = vld [vmem:[%s413_s0 + $0x10] sm:$0xff] }
   0x2   :  { %v212_v1 = vld [vmem:[%s415_s2] ss:$0 sm:$0xff]  ;;  %v60_v9 = vld [vmem:[%s414_s1 + $0x8] sm:$0xff]  ;;  %v61_v11 = vld [vmem:[%s414_s1 + $0x10] sm:$0xff] }
   0x3   :  { %v59_v2 = vld [vmem:[%s414_s1] sm:$0xff]  ;;  %v43_v3 = vmul.f32 %v212_v1, %v20_v0  ;;  %v44_v8 = vmul.f32 %v212_v1, %v21_v6  ;;  %v45_v13 = vmul.f32 %v212_v1, %v22_v10  ;;  %v23_v15 = vld [vmem:[%s413_s0 + $0x18] sm:$0xff]  ;;  %v25_v23 = vld [vmem:[%s413_s0 + $0x28] sm:$0xff] }
   0x4   :  { %v221_v4 = vld [vmem:[%s416_s3] ss:$0 sm:$0xff]  ;;  %v62_v16 = vld [vmem:[%s414_s1 + $0x18] sm:$0xff]  ;;  %v46_v19 = vmul.f32 %v212_v1, %v23_v15  ;;  %v64_v24 = vld [vmem:[%s414_s1 + $0x28] sm:$0xff]  ;;  %v48_v28 = vmul.f32 %v212_v1, %v25_v23 }
   0x5   :  { %v226_v5 = vld [vmem:[%s417_s4] ss:$0 sm:$0xff]  ;;  %v82_v7 = vmul.f32 %v221_v4, %v59_v2  ;;  %v83_v12 = vmul.f32 %v221_v4, %v60_v9  ;;  %v84_v14 = vmul.f32 %v221_v4, %v61_v11  ;;  %v85_v20 = vmul.f32 %v221_v4, %v62_v16  ;;  %v26_v29 = vld [vmem:[%s413_s0 + $0x30] sm:$0xff]  ;;  %v27_v31 = vld [vmem:[%s413_s0 + $0x38] sm:$0xff] }
   0x6   :  { %v24_v17 = vld [vmem:[%s413_s0 + $0x20] sm:$0xff]  ;;  %v65_v30 = vld [vmem:[%s414_s1 + $0x30] sm:$0xff]  ;;  %v87_v34 = vmul.f32 %v221_v4, %v64_v24  ;;  %v49_v35 = vmul.f32 %v212_v1, %v26_v29  ;;  %v66_v40 = vld [vmem:[%s414_s1 + $0x38] sm:$0xff]  ;;  %v50_v45 = vmul.f32 %v212_v1, %v27_v31 }
   0x7   :  { %v98_v18 = vadd.f32 %v82_v7, %v43_v3  ;;  %v47_v21 = vmul.f32 %v212_v1, %v24_v17  ;;  %v63_v22 = vld [vmem:[%s414_s1 + $0x20] sm:$0xff]  ;;  %v99_v25 = vadd.f32 %v83_v12, %v44_v8  ;;  %v100_v26 = vadd.f32 %v84_v14, %v45_v13  ;;  %v29_v47 = vld [vmem:[%s413_s0 + $0x48] sm:$0xff]  ;;  %v30_v53 = vld [vmem:[%s413_s0 + $0x50] sm:$0xff] }
   0x8   :  { %v86_v27 = vmul.f32 %v221_v4, %v63_v22  ;;  %v101_v33 = vadd.f32 %v85_v20, %v46_v19  ;;  %v88_v39 = vmul.f32 %v221_v4, %v65_v30  ;;  %v28_v41 = vld [vmem:[%s413_s0 + $0x40] sm:$0xff]  ;;  %v103_v44 = vadd.f32 %v87_v34, %v48_v28  ;;  %v68_v52 = vld [vmem:[%s414_s1 + $0x48] sm:$0xff]  ;;  %v69_v58 = vld [vmem:[%s414_s1 + $0x50] sm:$0xff] }
   0x9   :  { %v121_v32 = vadd.f32 %v226_v5, %v98_v18  ;;  %v122_v36 = vadd.f32 %v226_v5, %v99_v25  ;;  %v123_v37 = vadd.f32 %v226_v5, %v100_v26  ;;  %v67_v46 = vld [vmem:[%s414_s1 + $0x40] sm:$0xff]  ;;  %v89_v56 = vmul.f32 %v221_v4, %v66_v40  ;;  %v31_v59 = vld [vmem:[%s413_s0 + $0x58] sm:$0xff]  ;;  %v33_v10 = vld [vmem:[%s413_s0 + $0x68] sm:$0xff] }
   0xa   :  { %v102_v38 = vadd.f32 %v86_v27, %v47_v21  ;;  %v124_v43 = vadd.f32 %v226_v5, %v101_v33  ;;  %v104_v51 = vadd.f32 %v88_v39, %v49_v35  ;;  %v126_v55 = vadd.f32 %v226_v5, %v103_v44  ;;  %v70_v0 = vld [vmem:[%s414_s1 + $0x58] sm:$0xff]  ;;  %v32_v2 = vld [vmem:[%s413_s0 + $0x60] sm:$0xff]  ;;  %v72_v15 = vld [vmem:[%s414_s1 + $0x68] sm:$0xff] }
   0xb   :  { %v137_v42 = vmax.f32 %v121_v32, 0.0  ;;  %v138_v48 = vmax.f32 %v122_v36, 0.0  ;;  %v139_v49 = vmax.f32 %v123_v37, 0.0  ;;  %v51_v57 = vmul.f32 %v212_v1, %v28_v41  ;;  %v71_v9 = vld [vmem:[%s414_s1 + $0x60] sm:$0xff]  ;;  %v34_v20 = vld [vmem:[%s413_s0 + $0x70] sm:$0xff]  ;;  %v35_v30 = vld [vmem:[%s413_s0 + $0x78] sm:$0xff] }
   0xc   :  { %v125_v50 = vadd.f32 %v226_v5, %v102_v38  ;;  %v140_v54 = vmax.f32 %v124_v43, 0.0  ;;  %v127_v61 = vadd.f32 %v226_v5, %v104_v51  ;;  %v90_v62 = vmul.f32 %v221_v4, %v67_v46  ;;  %v73_v25 = vld [vmem:[%s414_s1 + $0x70] sm:$0xff]  ;;  %v74_v31 = vld [vmem:[%s414_s1 + $0x78] sm:$0xff] }
   0xd   :  { %153 = vst [vmem:[%s418_s5] sm:$0xff] %v137_v42  ;;  %154 = vst [vmem:[%s418_s5 + $0x8] sm:$0xff] %v138_v48  ;;  %v52_v63 = vmul.f32 %v212_v1, %v29_v47  ;;  %v142_v3 = vmax.f32 %v126_v55, 0.0  ;;  %v105_v6 = vadd.f32 %v89_v56, %v50_v45  ;;  %v91_v7 = vmul.f32 %v221_v4, %v68_v52 }
   0xe   :  { %155 = vst [vmem:[%s418_s5 + $0x10] sm:$0xff] %v139_v49  ;;  %v141_v60 = vmax.f32 %v125_v50, 0.0  ;;  %156 = vst [vmem:[%s418_s5 + $0x18] sm:$0xff] %v140_v54  ;;  %v53_v8 = vmul.f32 %v212_v1, %v30_v53  ;;  %v143_v11 = vmax.f32 %v127_v61, 0.0  ;;  %v106_v12 = vadd.f32 %v90_v62, %v51_v57 }
   0xf   :  { %v92_v13 = vmul.f32 %v221_v4, %v69_v58  ;;  %v54_v14 = vmul.f32 %v212_v1, %v31_v59  ;;  %158 = vst [vmem:[%s418_s5 + $0x28] sm:$0xff] %v142_v3  ;;  %v128_v16 = vadd.f32 %v226_v5, %v105_v6  ;;  %v107_v17 = vadd.f32 %v91_v7, %v52_v63 }
  0x10   :  { %157 = vst [vmem:[%s418_s5 + $0x20] sm:$0xff] %v141_v60  ;;  %v93_v18 = vmul.f32 %v221_v4, %v70_v0  ;;  %v55_v19 = vmul.f32 %v212_v1, %v32_v2  ;;  %159 = vst [vmem:[%s418_s5 + $0x30] sm:$0xff] %v143_v11  ;;  %v129_v21 = vadd.f32 %v226_v5, %v106_v12 }
  0x11   :  { %v108_v22 = vadd.f32 %v92_v13, %v53_v8  ;;  %v94_v23 = vmul.f32 %v221_v4, %v71_v9  ;;  %v56_v24 = vmul.f32 %v212_v1, %v33_v10  ;;  %v144_v26 = vmax.f32 %v128_v16, 0.0 }
  0x12   :  { %v130_v27 = vadd.f32 %v226_v5, %v107_v17  ;;  %v109_v28 = vadd.f32 %v93_v18, %v54_v14  ;;  %v95_v29 = vmul.f32 %v221_v4, %v72_v15  ;;  %v145_v32 = vmax.f32 %v129_v21, 0.0 }
  0x13   :  { %v131_v33 = vadd.f32 %v226_v5, %v108_v22  ;;  %v110_v34 = vadd.f32 %v94_v23, %v55_v19  ;;  %v57_v35 = vmul.f32 %v212_v1, %v34_v20  ;;  %160 = vst [vmem:[%s418_s5 + $0x38] sm:$0xff] %v144_v26  ;;  %v96_v39 = vmul.f32 %v221_v4, %v73_v25 }
  0x14   :  { %v146_v36 = vmax.f32 %v130_v27, 0.0  ;;  %v132_v37 = vadd.f32 %v226_v5, %v109_v28  ;;  %v111_v38 = vadd.f32 %v95_v29, %v56_v24  ;;  %161 = vst [vmem:[%s418_s5 + $0x40] sm:$0xff] %v145_v32  ;;  %v58_v42 = vmul.f32 %v212_v1, %v35_v30 }
  0x15   :  { %v147_v40 = vmax.f32 %v131_v33, 0.0  ;;  %v133_v41 = vadd.f32 %v226_v5, %v110_v34  ;;  %v97_v43 = vmul.f32 %v221_v4, %v74_v31  ;;  %v112_v46 = vadd.f32 %v96_v39, %v57_v35 }
  0x16   :  { %162 = vst [vmem:[%s418_s5 + $0x48] sm:$0xff] %v146_v36  ;;  %v148_v44 = vmax.f32 %v132_v37, 0.0  ;;  %v134_v45 = vadd.f32 %v226_v5, %v111_v38 }
  0x17   :  { %163 = vst [vmem:[%s418_s5 + $0x50] sm:$0xff] %v147_v40  ;;  %v149_v47 = vmax.f32 %v133_v41, 0.0  ;;  %v113_v48 = vadd.f32 %v97_v43, %v58_v42  ;;  %v135_v4 = vadd.f32 %v226_v5, %v112_v46 }
  0x18   :  { %164 = vst [vmem:[%s418_s5 + $0x58] sm:$0xff] %v148_v44  ;;  %v150_v1 = vmax.f32 %v134_v45, 0.0 }
  0x19   :  { %165 = vst [vmem:[%s418_s5 + $0x60] sm:$0xff] %v149_v47  ;;  %v136_v49 = vadd.f32 %v226_v5, %v113_v48  ;;  %v151_v50 = vmax.f32 %v135_v4, 0.0 }
  0x1a   :  { %166 = vst [vmem:[%s418_s5 + $0x68] sm:$0xff] %v150_v1 }
  0x1b   :  { %v152_v51 = vmax.f32 %v136_v49, 0.0  ;;  %167 = vst [vmem:[%s418_s5 + $0x70] sm:$0xff] %v151_v50 }
  0x1d   :  { %168 = vst [vmem:[%s418_s5 + $0x78] sm:$0xff] %v152_v51 }

// kernel: basic_block_forward.6
= control target key start
LH: loop header
LB: loop body
LE: loop exit
PB: predicated region body
PF: predicated region fallthrough
CT: control target
= control target key end

     0   :  { %vm562_vm0 = vcmask 1040384   ;;  %vm564_vm1 = vcmask 1041408   ;;  %vm566_vm2 = vcmask 1042432   ;;  %vm568_vm3 = vcmask 1043456   ;;  %s1057_s1 = inlined_call_operand.vmem [shape: bf16[128,128], index: 1, kind: input, shape index: {}]   ;;  %s1058_s3 = inlined_call_operand.vmem [shape: bf16[128,128], index: 3, kind: input, shape index: {}]   ;;  %s1059_s0 = inlined_call_operand.vmem [shape: bf16[128,128], index: 0, kind: input, shape index: {}]   ;;  %s1060_s2 = inlined_call_operand.vmem [shape: bf16[128,128], index: 2, kind: input, shape index: {}]   ;;  %s1061_s4 = inlined_call_operand.vmem [shape: f32[128,128], index: 4, kind: output, shape index: {0}]   ;;  %s1062_s5 = inlined_call_operand.vmem [shape: f32[128,128], index: 5, kind: output, shape index: {1}]   ;;  %s1063_s6 = inlined_call_operand.vmem [shape: f32[1,8,128], index: 6, kind: output, shape index: {2}]   ;;  %s1064_s7 = inlined_call_operand.vmem [shape: f32[1,8,128], index: 7, kind: output, shape index: {3}]  }
   0x1   :  { %v787_v0 = vld [vmem:[%s1057_s1 + $0x38] sm:$0xff]   ;;  %v789_v2 = vld [vmem:[%s1057_s1 + $0x30] sm:$0xff]   ;;  %v791_v4 = vld [vmem:[%s1057_s1 + $0x28] sm:$0xff]   ;;  %vm570_vm4 = vcmask 1044480   ;;  %vm572_vm5 = vcmask 1045504   ;;  %vm574_vm6 = vcmask 1046528  }
   0x2   :  { %v788_v1 = vld [vmem:[%s1058_s3 + $0x38] sm:$0xff]   ;;  %723 = vmatprep.subr.bf16.mxu0 %v787_v0  ;;  %v790_v3 = vld [vmem:[%s1058_s3 + $0x30] sm:$0xff]   ;;  %v792_v5 = vld [vmem:[%s1058_s3 + $0x28] sm:$0xff]  }
   0x3   :  { %755 = vmatprep.subr.bf16.mxu1 %v788_v1  ;;  %724 = vmatpush3.bf16.msra.mxu0 %v787_v0  ;;  %v793_v6 = vld [vmem:[%s1057_s1 + $0x20] sm:$0xff]   ;;  %v795_v8 = vld [vmem:[%s1057_s1 + $0x18] sm:$0xff]   ;;  %v797_v10 = vld [vmem:[%s1057_s1 + $0x10] sm:$0xff]  }
   0x4   :  { %756 = vmatpush3.bf16.msra.mxu1 %v788_v1  ;;  %725 = vmatprep.subr.bf16.mxu0 %v789_v2  ;;  %v794_v7 = vld [vmem:[%s1058_s3 + $0x20] sm:$0xff]   ;;  %v796_v9 = vld [vmem:[%s1058_s3 + $0x18] sm:$0xff]   ;;  %v798_v11 = vld [vmem:[%s1058_s3 + $0x10] sm:$0xff]  }
   0x5   :  { %757 = vmatprep.subr.bf16.mxu1 %v790_v3  ;;  %v803_v12 = vld [vmem:[%s1059_s0] sm:$0xff]   ;;  %v799_v14 = vld [vmem:[%s1057_s1 + $0x8] sm:$0xff]   ;;  %v807_v20 = vld [vmem:[%s1059_s0 + $0x10] sm:$0xff]  }
   0x6   :  { %v804_v13 = vld [vmem:[%s1060_s2] sm:$0xff]   ;;  %739 = vmatprep.mubr.bf16.mxu0 %v803_v12  ;;  %v800_v15 = vld [vmem:[%s1058_s3 + $0x8] sm:$0xff]   ;;  %v808_v21 = vld [vmem:[%s1060_s2 + $0x10] sm:$0xff]  }
   0x7   :  { %726 = vmatpush3.bf16.msra.mxu0 %v789_v2  ;;  %771 = vmatprep.mubr.bf16.mxu1 %v804_v13  ;;  %v801_v16 = vld [vmem:[%s1057_s1] sm:$0xff]   ;;  %v805_v18 = vld [vmem:[%s1059_s0 + $0x8] sm:$0xff]   ;;  %v809_v22 = vld [vmem:[%s1059_s0 + $0x18] sm:$0xff]  }
   0x8   :  { %758 = vmatpush3.bf16.msra.mxu1 %v790_v3  ;;  %727 = vmatprep.subr.bf16.mxu0 %v791_v4  ;;  %v802_v17 = vld [vmem:[%s1058_s3] sm:$0xff]   ;;  %v806_v19 = vld [vmem:[%s1060_s2 + $0x8] sm:$0xff]   ;;  %v810_v23 = vld [vmem:[%s1060_s2 + $0x18] sm:$0xff]  }
   0x9   :  { %759 = vmatprep.subr.bf16.mxu1 %v792_v5  ;;  %v811_v24 = vld [vmem:[%s1059_s0 + $0x20] sm:$0xff]   ;;  %v813_v26 = vld [vmem:[%s1059_s0 + $0x28] sm:$0xff]   ;;  %v815_v28 = vld [vmem:[%s1059_s0 + $0x30] sm:$0xff]  }
   0xa   :  { %v812_v25 = vld [vmem:[%s1060_s2 + $0x20] sm:$0xff]   ;;  %v814_v27 = vld [vmem:[%s1060_s2 + $0x28] sm:$0xff]   ;;  %v816_v29 = vld [vmem:[%s1060_s2 + $0x30] sm:$0xff]  }
   0xb   :  { %728 = vmatpush3.bf16.msra.mxu0 %v791_v4  ;;  %v817_v30 = vld [vmem:[%s1059_s0 + $0x38] sm:$0xff]  }
   0xc   :  { %760 = vmatpush3.bf16.msra.mxu1 %v792_v5  ;;  %729 = vmatprep.subr.bf16.mxu0 %v793_v6  ;;  %v818_v31 = vld [vmem:[%s1060_s2 + $0x38] sm:$0xff]  }
   0xd   :  { %761 = vmatprep.subr.bf16.mxu1 %v794_v7 }
   0xf   :  { %730 = vmatpush3.bf16.msra.mxu0 %v793_v6 }
  0x10   :  { %762 = vmatpush3.bf16.msra.mxu1 %v794_v7  ;;  %731 = vmatprep.subr.bf16.mxu0 %v795_v8 }
  0x11   :  { %763 = vmatprep.subr.bf16.mxu1 %v796_v9 }
  0x13   :  { %732 = vmatpush3.bf16.msra.mxu0 %v795_v8 }
  0x14   :  { %764 = vmatpush3.bf16.msra.mxu1 %v796_v9  ;;  %733 = vmatprep.subr.bf16.mxu0 %v797_v10 }
  0x15   :  { %765 = vmatprep.subr.bf16.mxu1 %v798_v11 }
  0x17   :  { %734 = vmatpush3.bf16.msra.mxu0 %v797_v10 }
  0x18   :  { %766 = vmatpush3.bf16.msra.mxu1 %v798_v11  ;;  %735 = vmatprep.subr.bf16.mxu0 %v799_v14 }
  0x19   :  { %767 = vmatprep.subr.bf16.mxu1 %v800_v15 }
  0x1b   :  { %736 = vmatpush3.bf16.msra.mxu0 %v799_v14 }
  0x1c   :  { %768 = vmatpush3.bf16.msra.mxu1 %v800_v15  ;;  %737 = vmatprep.subr.bf16.mxu0 %v801_v16 }
  0x1d   :  { %769 = vmatprep.subr.bf16.mxu1 %v802_v17 }
  0x1f   :  { %738 = vmatpush3.bf16.msra.mxu0 %v801_v16 }
  0x20   :  { %770 = vmatpush3.bf16.msra.mxu1 %v802_v17 }
  0x22   :  { %740 = vmatmul.mubr.bf16.vlgmr.msra.gmra.mxu0 %v805_v18 }
  0x23   :  { %772 = vmatmul.mubr.bf16.vlgmr.msra.gmra.mxu1 %v806_v19  ;;  %743 = vmatprep.mubr.bf16.mxu0 %v807_v20 }
  0x24   :  { %775 = vmatprep.mubr.bf16.mxu1 %v808_v21 }
  0x2a   :  { %744 = vmatmul.mubr.bf16.gmra.mxu0 %v809_v22 }
  0x2b   :  { %776 = vmatmul.mubr.bf16.gmra.mxu1 %v810_v23  ;;  %747 = vmatprep.mubr.bf16.mxu0 %v811_v24 }
  0x2c   :  { %779 = vmatprep.mubr.bf16.mxu1 %v812_v25 }
  0x32   :  { %748 = vmatmul.mubr.bf16.gmra.mxu0 %v813_v26 }
  0x33   :  { %780 = vmatmul.mubr.bf16.gmra.mxu1 %v814_v27  ;;  %751 = vmatprep.mubr.bf16.mxu0 %v815_v28 }
  0x34   :  { %783 = vmatprep.mubr.bf16.mxu1 %v816_v29 }
  0x3a   :  { %752 = vmatmul.mubr.bf16.gmra.mxu0 %v817_v30 }
  0x3b   :  { %784 = vmatmul.mubr.bf16.gmra.mxu1 %v818_v31 }
  0xe2   :  { %v741_v32 = vpop.f32.mrf.mxu0 }
  0xe3   :  { %474 = vst [vmem:[%s1061_s4 + $0x10] sm:$0xff] %v741_v32  ;;  %v773_v33 = vpop.f32.mrf.mxu1  ;;  %v527_v47 = vmul.f32 %v741_v32, %v741_v32 }
  0xe4   :  { %490 = vst [vmem:[%s1062_s5 + $0x10] sm:$0xff] %v773_v33  ;;  %v184_v34 = vpop.f32.mrf.mxu0  ;;  %v600_v51 = vmul.f32 %v773_v33, %v773_v33 }
  0xe5   :  { %472 = vst [vmem:[%s1061_s4] sm:$0xff] %v184_v34  ;;  %v409_v35 = vpop.f32.mrf.mxu1  ;;  %v525_v39 = vmul.f32 %v184_v34, %v184_v34 }
  0xe6   :  { %488 = vst [vmem:[%s1062_s5] sm:$0xff] %v409_v35  ;;  %v742_v36 = vpop.f32.mrf.mxu0  ;;  %v598_v43 = vmul.f32 %v409_v35, %v409_v35 }
  0xe7   :  { %475 = vst [vmem:[%s1061_s4 + $0x18] sm:$0xff] %v742_v36  ;;  %v774_v37 = vpop.f32.mrf.mxu1  ;;  %v528_v55 = vmul.f32 %v742_v36, %v742_v36 }
  0xe8   :  { %491 = vst [vmem:[%s1062_s5 + $0x18] sm:$0xff] %v774_v37  ;;  %v187_v38 = vpop.f32.mrf.mxu0  ;;  %v601_v59 = vmul.f32 %v774_v37, %v774_v37 }
  0xe9   :  { %473 = vst [vmem:[%s1061_s4 + $0x8] sm:$0xff] %v187_v38  ;;  %v504_v40 = vadd.f32 %v187_v38, %v184_v34  ;;  %v526_v41 = vmul.f32 %v187_v38, %v187_v38  ;;  %v412_v42 = vpop.f32.mrf.mxu1 }
  0xea   :  { %489 = vst [vmem:[%s1062_s5 + $0x8] sm:$0xff] %v412_v42  ;;  %v577_v44 = vadd.f32 %v412_v42, %v409_v35  ;;  %v599_v45 = vmul.f32 %v412_v42, %v412_v42  ;;  %v745_v46 = vpop.f32.mrf.mxu0 }
  0xeb   :  { %v505_v48 = vadd.f32 %v741_v32, %v504_v40  ;;  %v541_v49 = vadd.f32 %v526_v41, %v525_v39  ;;  %478 = vst [vmem:[%s1061_s4 + $0x30] sm:$0xff] %v745_v46  ;;  %v777_v50 = vpop.f32.mrf.mxu1  ;;  %v531_v15 = vmul.f32 %v745_v46, %v745_v46 }
  0xec   :  { %v578_v52 = vadd.f32 %v773_v33, %v577_v44  ;;  %v614_v53 = vadd.f32 %v599_v45, %v598_v43  ;;  %494 = vst [vmem:[%s1062_s5 + $0x30] sm:$0xff] %v777_v50  ;;  %v200_v54 = vpop.f32.mrf.mxu0  ;;  %v604_v19 = vmul.f32 %v777_v50, %v777_v50 }
  0xed   :  { %v542_v56 = vadd.f32 %v541_v49, %v527_v47  ;;  %476 = vst [vmem:[%s1061_s4 + $0x20] sm:$0xff] %v200_v54  ;;  %v506_v57 = vadd.f32 %v742_v36, %v505_v48  ;;  %v425_v58 = vpop.f32.mrf.mxu1  ;;  %v529_v0 = vmul.f32 %v200_v54, %v200_v54 }
  0xee   :  { %v615_v60 = vadd.f32 %v614_v53, %v600_v51  ;;  %492 = vst [vmem:[%s1062_s5 + $0x20] sm:$0xff] %v425_v58  ;;  %v579_v61 = vadd.f32 %v774_v37, %v578_v52  ;;  %v746_v62 = vpop.f32.mrf.mxu0  ;;  %v602_v4 = vmul.f32 %v425_v58, %v425_v58 }
  0xef   :  { %v507_v63 = vadd.f32 %v506_v57, %v200_v54  ;;  %v543_v1 = vadd.f32 %v542_v56, %v528_v55  ;;  %479 = vst [vmem:[%s1061_s4 + $0x38] sm:$0xff] %v746_v62  ;;  %v778_v2 = vpop.f32.mrf.mxu1  ;;  %v532_v23 = vmul.f32 %v746_v62, %v746_v62 }
  0xf0   :  { %v580_v3 = vadd.f32 %v579_v61, %v425_v58  ;;  %v616_v5 = vadd.f32 %v615_v60, %v601_v59  ;;  %495 = vst [vmem:[%s1062_s5 + $0x38] sm:$0xff] %v778_v2  ;;  %v203_v6 = vpop.f32.mrf.mxu0  ;;  %v605_v27 = vmul.f32 %v778_v2, %v778_v2 }
  0xf1   :  { %v544_v7 = vadd.f32 %v543_v1, %v529_v0  ;;  %477 = vst [vmem:[%s1061_s4 + $0x28] sm:$0xff] %v203_v6  ;;  %v508_v8 = vadd.f32 %v507_v63, %v203_v6  ;;  %v530_v9 = vmul.f32 %v203_v6, %v203_v6  ;;  %v428_v10 = vpop.f32.mrf.mxu1 }
  0xf2   :  { %v617_v11 = vadd.f32 %v616_v5, %v602_v4  ;;  %493 = vst [vmem:[%s1062_s5 + $0x28] sm:$0xff] %v428_v10  ;;  %v581_v12 = vadd.f32 %v580_v3, %v428_v10  ;;  %v603_v13 = vmul.f32 %v428_v10, %v428_v10  ;;  %v749_v14 = vpop.f32.mrf.mxu0 }
  0xf3   :  { %v509_v16 = vadd.f32 %v745_v46, %v508_v8  ;;  %v545_v17 = vadd.f32 %v544_v7, %v530_v9  ;;  %482 = vst [vmem:[%s1061_s4 + $0x50] sm:$0xff] %v749_v14  ;;  %v781_v18 = vpop.f32.mrf.mxu1  ;;  %v535_v47 = vmul.f32 %v749_v14, %v749_v14 }
  0xf4   :  { %v582_v20 = vadd.f32 %v777_v50, %v581_v12  ;;  %v618_v21 = vadd.f32 %v617_v11, %v603_v13  ;;  %498 = vst [vmem:[%s1062_s5 + $0x50] sm:$0xff] %v781_v18  ;;  %v216_v22 = vpop.f32.mrf.mxu0  ;;  %v608_v51 = vmul.f32 %v781_v18, %v781_v18 }
  0xf5   :  { %v546_v24 = vadd.f32 %v545_v17, %v531_v15  ;;  %480 = vst [vmem:[%s1061_s4 + $0x40] sm:$0xff] %v216_v22  ;;  %v510_v25 = vadd.f32 %v746_v62, %v509_v16  ;;  %v441_v26 = vpop.f32.mrf.mxu1  ;;  %v533_v32 = vmul.f32 %v216_v22, %v216_v22 }
  0xf6   :  { %v619_v28 = vadd.f32 %v618_v21, %v604_v19  ;;  %496 = vst [vmem:[%s1062_s5 + $0x40] sm:$0xff] %v441_v26  ;;  %v583_v29 = vadd.f32 %v778_v2, %v582_v20  ;;  %v750_v30 = vpop.f32.mrf.mxu0  ;;  %v606_v36 = vmul.f32 %v441_v26, %v441_v26 }
  0xf7   :  { %v511_v31 = vadd.f32 %v510_v25, %v216_v22  ;;  %v547_v33 = vadd.f32 %v546_v24, %v532_v23  ;;  %483 = vst [vmem:[%s1061_s4 + $0x58] sm:$0xff] %v750_v30  ;;  %v782_v34 = vpop.f32.mrf.mxu1  ;;  %v536_v55 = vmul.f32 %v750_v30, %v750_v30 }
  0xf8   :  { %v584_v35 = vadd.f32 %v583_v29, %v441_v26  ;;  %v620_v37 = vadd.f32 %v619_v28, %v605_v27  ;;  %499 = vst [vmem:[%s1062_s5 + $0x58] sm:$0xff] %v782_v34  ;;  %v219_v38 = vpop.f32.mrf.mxu0  ;;  %v609_v59 = vmul.f32 %v782_v34, %v782_v34 }
  0xf9   :  { %v548_v39 = vadd.f32 %v547_v33, %v533_v32  ;;  %481 = vst [vmem:[%s1061_s4 + $0x48] sm:$0xff] %v219_v38  ;;  %v512_v40 = vadd.f32 %v511_v31, %v219_v38  ;;  %v534_v41 = vmul.f32 %v219_v38, %v219_v38  ;;  %v444_v42 = vpop.f32.mrf.mxu1 }
  0xfa   :  { %v621_v43 = vadd.f32 %v620_v37, %v606_v36  ;;  %497 = vst [vmem:[%s1062_s5 + $0x48] sm:$0xff] %v444_v42  ;;  %v585_v44 = vadd.f32 %v584_v35, %v444_v42  ;;  %v607_v45 = vmul.f32 %v444_v42, %v444_v42  ;;  %v753_v46 = vpop.f32.mrf.mxu0 }
  0xfb   :  { %v513_v48 = vadd.f32 %v749_v14, %v512_v40  ;;  %v549_v49 = vadd.f32 %v548_v39, %v534_v41  ;;  %486 = vst [vmem:[%s1061_s4 + $0x70] sm:$0xff] %v753_v46  ;;  %v785_v50 = vpop.f32.mrf.mxu1  ;;  %v539_v14 = vmul.f32 %v753_v46, %v753_v46 }
  0xfc   :  { %v586_v52 = vadd.f32 %v781_v18, %v585_v44  ;;  %v622_v53 = vadd.f32 %v621_v43, %v607_v45  ;;  %502 = vst [vmem:[%s1062_s5 + $0x70] sm:$0xff] %v785_v50  ;;  %v232_v54 = vpop.f32.mrf.mxu0  ;;  %v612_v17 = vmul.f32 %v785_v50, %v785_v50 }
  0xfd   :  { %v550_v56 = vadd.f32 %v549_v49, %v535_v47  ;;  %484 = vst [vmem:[%s1061_s4 + $0x60] sm:$0xff] %v232_v54  ;;  %v514_v57 = vadd.f32 %v750_v30, %v513_v48  ;;  %v457_v58 = vpop.f32.mrf.mxu1  ;;  %v537_v0 = vmul.f32 %v232_v54, %v232_v54 }
  0xfe   :  { %v623_v60 = vadd.f32 %v622_v53, %v608_v51  ;;  %500 = vst [vmem:[%s1062_s5 + $0x60] sm:$0xff] %v457_v58  ;;  %v587_v61 = vadd.f32 %v782_v34, %v586_v52  ;;  %v754_v62 = vpop.f32.mrf.mxu0  ;;  %v610_v4 = vmul.f32 %v457_v58, %v457_v58 }
  0xff   :  { %v515_v63 = vadd.f32 %v514_v57, %v232_v54  ;;  %v551_v1 = vadd.f32 %v550_v56, %v536_v55  ;;  %487 = vst [vmem:[%s1061_s4 + $0x78] sm:$0xff] %v754_v62  ;;  %v786_v2 = vpop.f32.mrf.mxu1  ;;  %v540_v20 = vmul.f32 %v754_v62, %v754_v62 }
 0x100   :  { %v588_v3 = vadd.f32 %v587_v61, %v457_v58  ;;  %v624_v5 = vadd.f32 %v623_v60, %v609_v59  ;;  %503 = vst [vmem:[%s1062_s5 + $0x78] sm:$0xff] %v786_v2  ;;  %v235_v6 = vpop.f32.mrf.mxu0  ;;  %v613_v23 = vmul.f32 %v786_v2, %v786_v2 }
 0x101   :  { %v552_v7 = vadd.f32 %v551_v1, %v537_v0  ;;  %485 = vst [vmem:[%s1061_s4 + $0x68] sm:$0xff] %v235_v6  ;;  %v516_v8 = vadd.f32 %v515_v63, %v235_v6  ;;  %v538_v9 = vmul.f32 %v235_v6, %v235_v6  ;;  %v460_v10 = vpop.f32.mrf.mxu1 }
 0x102   :  { %v625_v11 = vadd.f32 %v624_v5, %v610_v4  ;;  %501 = vst [vmem:[%s1062_s5 + $0x68] sm:$0xff] %v460_v10  ;;  %v589_v12 = vadd.f32 %v588_v3, %v460_v10  ;;  %v611_v13 = vmul.f32 %v460_v10, %v460_v10 }
 0x103   :  { %v517_v15 = vadd.f32 %v753_v46, %v516_v8  ;;  %v553_v16 = vadd.f32 %v552_v7, %v538_v9 }
 0x104   :  { %v590_v18 = vadd.f32 %v785_v50, %v589_v12  ;;  %v626_v19 = vadd.f32 %v625_v11, %v611_v13 }
 0x105   :  { %v518_v21 = vadd.f32 %v754_v62, %v517_v15  ;;  %v554_v22 = vadd.f32 %v553_v16, %v539_v14 }
 0x106   :  { %v591_v24 = vadd.f32 %v786_v2, %v590_v18  ;;  %v627_v25 = vadd.f32 %v626_v19, %v612_v17 }
 0x107   :  { %v519_v26 = vrot.slane %v518_v21, 4  ;;  %v555_v27 = vadd.f32 %v554_v22, %v540_v20 }
 0x108   :  { %v592_v28 = vrot.slane %v591_v24, 4  ;;  %v628_v29 = vadd.f32 %v627_v25, %v613_v23 }
 0x109   :  { %v520_v30 = vadd.f32 %v519_v26, %v518_v21  ;;  %v556_v31 = vrot.slane %v555_v27, 4 }
 0x10a   :  { %v593_v32 = vadd.f32 %v592_v28, %v591_v24  ;;  %v629_v33 = vrot.slane %v628_v29, 4 }
 0x10b   :  { %v521_v34 = vrot.slane %v520_v30, 2  ;;  %v557_v35 = vadd.f32 %v556_v31, %v555_v27 }
 0x10c   :  { %v594_v36 = vrot.slane %v593_v32, 2  ;;  %v630_v37 = vadd.f32 %v629_v33, %v628_v29 }
 0x10d   :  { %v522_v38 = vadd.f32 %v521_v34, %v520_v30  ;;  %v558_v39 = vrot.slane %v557_v35, 2 }
 0x10e   :  { %v595_v40 = vadd.f32 %v594_v36, %v593_v32  ;;  %v631_v41 = vrot.slane %v630_v37, 2 }
 0x10f   :  { %v523_v42 = vrot.slane %v522_v38, 1  ;;  %v559_v43 = vadd.f32 %v558_v39, %v557_v35 }
 0x110   :  { %v596_v44 = vrot.slane %v595_v40, 1  ;;  %v632_v45 = vadd.f32 %v631_v41, %v630_v37 }
 0x111   :  { %v560_v46 = vrot.slane %v559_v43, 1  ;;  %v524_v48 = vadd.f32 %v523_v42, %v522_v38 }
 0x112   :  { %v633_v47 = vrot.slane %v632_v45, 1  ;;  %v597_v50 = vadd.f32 %v596_v44, %v595_v40 }
 0x113   :  { %v561_v49 = vadd.f32 %v560_v46, %v559_v43 }
 0x114   :  { %v634_v51 = vadd.f32 %v633_v47, %v632_v45 }
 0x115   :  { %v563_v52 = vsel %vm562_vm0, %v524_v48, %v561_v49 }
 0x116   :  { %v565_v53 = vsel %vm564_vm1, %v563_v52, 0.0  ;;  %v635_v54 = vsel %vm562_vm0, %v597_v50, %v634_v51 }
 0x117   :  { %v567_v55 = vsel %vm566_vm2, %v565_v53, 0.0  ;;  %v636_v56 = vsel %vm564_vm1, %v635_v54, 0.0 }
 0x118   :  { %v569_v57 = vsel %vm568_vm3, %v567_v55, 0.0  ;;  %v637_v58 = vsel %vm566_vm2, %v636_v56, 0.0 }
 0x119   :  { %v571_v59 = vsel %vm570_vm4, %v569_v57, 0.0  ;;  %v638_v60 = vsel %vm568_vm3, %v637_v58, 0.0 }
 0x11a   :  { %v573_v61 = vsel %vm572_vm5, %v571_v59, 0.0  ;;  %v639_v62 = vsel %vm570_vm4, %v638_v60, 0.0 }
 0x11b   :  { %v575_v63 = vsel %vm574_vm6, %v573_v61, 0.0  ;;  %v640_v0 = vsel %vm572_vm5, %v639_v62, 0.0 }
 0x11c   :  { %576 = vst [vmem:[%s1063_s6] sm:$0xff] %v575_v63  ;;  %v641_v1 = vsel %vm574_vm6, %v640_v0, 0.0 }
 0x11d   :  { %642 = vst [vmem:[%s1064_s7] sm:$0xff] %v641_v1 }

</bundles_post_ra>
